<compile_context>
chip_gen: v6e
topology: v6e:2x2x1
jax: 0.10.0
libtpu: 0.0.40
codegen_flags: <defaults>
</compile_context>

<pallas_src>
import numpy as np
import jax
import jax.numpy as jnp
from jax import lax
from jax.experimental import pallas as pl
from jax.experimental.pallas import tpu as pltpu


def _round_up(x, m):
    return ((x + m - 1) // m) * m


def _wv_layout(C):
    """Column layout of the consolidated (2C, cols) parameter slab."""
    KP = _round_up(9 * C, 8)       # zero-padded K of the conv2 MXU matmul
    OW1 = KP                       # 9 cols of conv1 per-row / per-tap coeffs
    OG = OW1 + 9                   # gamma column
    OB = OG + 1                    # beta column
    OWC0 = OG + 2                  # classifier weights for logit 0
    OWC1 = OG + 3                  # classifier weights for logit 1
    OBC = OG + 4                   # classifier bias (rows 0..1)
    cols = OBC + 1
    return KP, OW1, OG, OB, OWC0, OWC1, OBC, cols


def _make_teem_kernel(N, C, F, H, W, Lp):
    Wf = W + 2
    NLp = N * Lp
    KP, OW1, OG, OB, OWC0, OWC1, OBC, _ = _wv_layout(C)
    EPS = 1e-5
    inv_cnt = 1.0 / float(N * H * W)
    inv_hw = 1.0 / float(H * W)

    def shift(a, d):
        # shift(a, d)[.., q] = a[.., (q + d) % NLp].  For interior pixels the
        # wraparound never triggers, so this is exactly the (dh, dw) conv tap;
        # wrap/halo lanes are masked out of every reduction.
        d = d % NLp
        if d == 0:
            return a
        return pltpu.roll(a, NLp - d, axis=1)

    def kernel(x_ref, wv_ref, out_ref, taps_ref):
        X = x_ref[...]            # (2C, N*Lp): rows 0..C-1 = x2, rows C..2C-1 = x1
        wv = wv_ref[...]          # (2C, cols) consolidated parameters (1 vreg)

        # ---- early_conv2d_1: 3x3, 2C -> 1, pad=1 (channel concat folded) ----
        # One roll per tap moves ALL 2C packed channel rows at once; per-row
        # weights come from a lane-broadcast column of the parameter slab.
        # The channel contraction is one cross-sublane reduce at the end.
        acc8 = None
        for kh in range(3):
            for kw in range(3):
                t = kh * 3 + kw
                d = (kh - 1) * Wf + (kw - 1)
                term = shift(X, d) * wv[:, OW1 + t:OW1 + t + 1]
                acc8 = term if acc8 is None else acc8 + term
        acc1 = jnp.sum(acc8, axis=0, keepdims=True)                  # (1, N*Lp)
        gate = pl.reciprocal(1.0 + jnp.exp(-acc1), approx=True)      # sigmoid (EUP)

        # ---- early_conv2d_3: 3x3, C -> F, pad=1, as ONE MXU matmul ----
        # gated = gate * x2 keeps an exact zero halo (x2 halo / lane pad are 0),
        # so the lane rolls reproduce zero padding.  NOTE: conv2 correctness
        # relies on those lanes being exactly zero in X's x2 rows.
        G = gate * X[0:C, :]                                         # (C, N*Lp)
        for kh in range(3):
            for kw in range(3):
                t = kh * 3 + kw
                d = (kh - 1) * Wf + (kw - 1)
                taps_ref[t * C:(t + 1) * C, :] = shift(G, d)
        if KP > 9 * C:
            # Zero the padded K rows (0-weight * uninitialized could be NaN).
            taps_ref[9 * C:KP, :] = jnp.zeros((KP - 9 * C, NLp), jnp.float32)
        Y = jnp.dot(wv[:, 0:KP], taps_ref[...],
                    preferred_element_type=jnp.float32)[0:F, :]      # (F, N*Lp)

        # ---- interior-pixel mask, generated in-kernel (saves a DMA) ----
        q = lax.broadcasted_iota(jnp.int32, (1, NLp), 1).astype(jnp.float32)
        p = q - Lp * jnp.floor((q + 0.5) * (1.0 / Lp))               # q mod Lp
        r = jnp.floor((p + 0.5) * (1.0 / Wf))
        c = p - r * Wf
        mask = (((r >= 1.0) & (r <= float(H))) &
                ((c >= 1.0) & (c <= float(W)))).astype(jnp.float32)  # (1, N*Lp)

        # ---- BatchNorm2d (training-mode batch stats, two-pass) + ReLU
        #      + AdaptiveAvgPool2d((1,1)) over the real HxW window ----
        gamma = wv[0:F, OG:OG + 1]
        beta = wv[0:F, OB:OB + 1]
        mean = jnp.sum(Y * mask, axis=1, keepdims=True) * inv_cnt    # (F, 1)
        Yc = (Y - mean) * mask
        var = jnp.sum(Yc * Yc, axis=1, keepdims=True) * inv_cnt      # (F, 1)
        scale = lax.rsqrt(var + EPS) * gamma
        yr = jnp.maximum(Yc * scale + beta, 0.0) * mask              # (F, N*Lp)
        pools = [jnp.sum(yr[:, n * Lp:(n + 1) * Lp], axis=1, keepdims=True) * inv_hw
                 for n in range(N)]
        P = jnp.concatenate(pools, axis=1)                           # (F, N)

        # ---- classifier: Linear(F, 2) + Softmax(dim=1) ----
        wc0 = wv[0:F, OWC0:OWC0 + 1]
        wc1 = wv[0:F, OWC1:OWC1 + 1]
        l0 = jnp.sum(P * wc0, axis=0, keepdims=True) + wv[0:1, OBC:OBC + 1]  # (1, N)
        l1 = jnp.sum(P * wc1, axis=0, keepdims=True) + wv[1:2, OBC:OBC + 1]
        m = jnp.maximum(l0, l1)
        e0 = jnp.exp(l0 - m)
        e1 = jnp.exp(l1 - m)
        inv = 1.0 / (e0 + e1)      # tiny (1, N); keep the exact reciprocal here
        out_ref[...] = jnp.concatenate([e0 * inv, e1 * inv], axis=0)  # (2, N), one store

    return kernel


def teem_forward(x1, x2, params):
    N, C, H, W = x1.shape
    F = params["w3"].shape[0]
    assert F <= 2 * C and 2 <= 2 * C, "parameter slab assumes F, 2 <= 2*C"
    Wf = W + 2
    L = (H + 2) * Wf
    Lp = _round_up(L, 128)
    NLp = N * Lp
    KP, OW1, OG, OB, OWC0, OWC1, OBC, cols = _wv_layout(C)

    def to_rows(x):
        # (N, C, H, W) -> (C, N*Lp): 1-pixel zero conv halo, spatial flattened
        # onto lanes, per-image planes laid side by side on the lane axis.
        x = jnp.pad(x.astype(jnp.float32), ((0, 0), (0, 0), (1, 1), (1, 1)))
        x = x.reshape(N, C, L)
        x = jnp.pad(x, ((0, 0), (0, 0), (0, Lp - L)))
        return jnp.transpose(x, (1, 0, 2)).reshape(C, NLp)

    X = jnp.concatenate([to_rows(x2), to_rows(x1)], axis=0)          # (2C, N*Lp)

    # Fold the channel concatenation into the first conv's weights:
    # conv(cat(x2-x1, x2), w1) == conv(x2, w1[:, :C]+w1[:, C:]) + conv(x1, -w1[:, :C])
    w1 = params["w1"].astype(jnp.float32)                            # (1, 2C, 3, 3)
    coef = jnp.concatenate([(w1[0, :C] + w1[0, C:]).reshape(C, 9),   # x2 rows
                            (-w1[0, :C]).reshape(C, 9)], axis=0)     # x1 rows

    # conv2 weights reordered to the tap-major row order of the taps scratch:
    # W3r[f, t*C + c] = w3[f, c, kh, kw],  t = kh*3 + kw.
    w3r = jnp.transpose(params["w3"].astype(jnp.float32), (0, 2, 3, 1)).reshape(F, 9 * C)

    # One consolidated parameter slab -> a single small DMA.
    WV = jnp.zeros((2 * C, cols), jnp.float32)
    WV = WV.at[0:F, 0:9 * C].set(w3r)
    WV = WV.at[:, OW1:OW1 + 9].set(coef)
    WV = WV.at[0:F, OG].set(params["gamma"].astype(jnp.float32))
    WV = WV.at[0:F, OB].set(params["beta"].astype(jnp.float32))
    WV = WV.at[0:F, OWC0].set(params["wc"][0].astype(jnp.float32))
    WV = WV.at[0:F, OWC1].set(params["wc"][1].astype(jnp.float32))
    WV = WV.at[0:2, OBC].set(params["bc"].astype(jnp.float32))

    kernel = _make_teem_kernel(N, C, F, H, W, Lp)
    vmem = pl.BlockSpec(memory_space=pltpu.MemorySpace.VMEM)
    out = pl.pallas_call(
        kernel,
        out_shape=jax.ShapeDtypeStruct((2, N), jnp.float32),
        in_specs=[vmem, vmem],
        out_specs=vmem,
        scratch_shapes=[pltpu.VMEM((KP, NLp), jnp.float32)],
    )(X, WV)
    return out.T                                                      # (N, 2)


def init_params(key, chn, final):
    C = chn
    F = final if final != 0 else 2
    k1, k2, k3, k4 = jax.random.split(key, 4)
    b1 = 1.0 / np.sqrt(2 * C * 9)
    b3 = 1.0 / np.sqrt(C * 9)
    bl = 1.0 / np.sqrt(F)
    return {
        "w1": jax.random.uniform(k1, (1, 2 * C, 3, 3), jnp.float32, -b1, b1),
        "w3": jax.random.uniform(k2, (F, C, 3, 3), jnp.float32, -b3, b3),
        "gamma": jnp.ones((F,), jnp.float32),   # nn.BatchNorm2d default weight
        "beta": jnp.zeros((F,), jnp.float32),   # nn.BatchNorm2d default bias
        "wc": jax.random.uniform(k3, (2, F), jnp.float32, -bl, bl),
        "bc": jax.random.uniform(k4, (2,), jnp.float32, -bl, bl),
    }


def teem_reference(x1, x2, params):
    """Pure-JAX reference mirroring the PyTorch forward (training-mode BN)."""
    def conv(x, w):
        return lax.conv_general_dilated(
            x, w, window_strides=(1, 1), padding=((1, 1), (1, 1)),
            dimension_numbers=("NCHW", "OIHW", "NCHW"),
            precision=lax.Precision.HIGHEST)

    xcat = jnp.concatenate([x2 - x1, x2], axis=1)
    gate = jax.nn.sigmoid(conv(xcat, params["w1"]))
    y = conv(gate * x2, params["w3"])
    mean = jnp.mean(y, axis=(0, 2, 3), keepdims=True)
    var = jnp.mean((y - mean) ** 2, axis=(0, 2, 3), keepdims=True)
    y = (y - mean) / jnp.sqrt(var + 1e-5)
    y = y * params["gamma"][None, :, None, None] + params["beta"][None, :, None, None]
    y = jnp.maximum(y, 0.0)
    pooled = jnp.mean(y, axis=(2, 3))
    logits = jnp.dot(pooled, params["wc"].T, precision=lax.Precision.HIGHEST) + params["bc"]
    return jax.nn.softmax(logits, axis=1)


if __name__ == "__main__":
    key = jax.random.PRNGKey(0)
    kx1, kx2, kp = jax.random.split(key, 3)
    N, CHN, H, W, FINAL = 2, 4, 16, 16, 4     # TEEM(chn=4, final=4)

    x1 = jax.random.normal(kx1, (N, CHN, H, W), jnp.float32)
    x2 = jax.random.normal(kx2, (N, CHN, H, W), jnp.float32)
    params = init_params(kp, CHN, FINAL)

    out = jax.jit(teem_forward)(x1, x2, params)
    out = jax.block_until_ready(out)

    ref = teem_reference(x1, x2, params)
    # atol slightly above 1e-4 to leave margin for the approximate EUP
    # reciprocal used in the conv1 sigmoid gate.
    np.testing.assert_allclose(np.asarray(out), np.asarray(ref), atol=2e-4, rtol=1e-3)
    assert out.shape == (N, 2)
    print("KERNEL_OK")
</pallas_src>

<mosaic_0001>
module attributes {stable_mosaic.version = 11 : i64} {
  func.func @kernel(%arg0: memref<8x768xf32, #tpu.memory_space<vmem>>, %arg1: memref<8x54xf32, #tpu.memory_space<vmem>>, %arg2: memref<2x2xf32, #tpu.memory_space<vmem>>, %arg3: memref<40x768xf32, #tpu.memory_space<vmem>>) attributes {dimension_semantics = [], scalar_prefetch = 0 : i64, scratch_operands = 1 : i64, tpu.core_type = #tpu.core_type<tc>} {
    %c0 = arith.constant 0 : index
    %c0_0 = arith.constant 0 : index
    %0 = vector.load %arg0[%c0, %c0_0] : memref<8x768xf32, #tpu.memory_space<vmem>>, vector<8x768xf32>
    %c0_1 = arith.constant 0 : index
    %c0_2 = arith.constant 0 : index
    %1 = vector.load %arg1[%c0_1, %c0_2] : memref<8x54xf32, #tpu.memory_space<vmem>>, vector<8x54xf32>
    %c19_i32 = arith.constant 19 : i32
    %2 = tpu.dynamic_rotate %0 by %c19_i32 dim 1 : vector<8x768xf32>, i32 -> vector<8x768xf32>
    %3 = vector.extract_strided_slice %1 {offsets = [0, 40], sizes = [8, 1], strides = [1, 1]} : vector<8x54xf32> to vector<8x1xf32>
    %4 = vector.broadcast %3 : vector<8x1xf32> to vector<8x768xf32>
    %5 = arith.mulf %2, %4 : vector<8x768xf32>
    %c18_i32 = arith.constant 18 : i32
    %6 = tpu.dynamic_rotate %0 by %c18_i32 dim 1 : vector<8x768xf32>, i32 -> vector<8x768xf32>
    %7 = vector.extract_strided_slice %1 {offsets = [0, 41], sizes = [8, 1], strides = [1, 1]} : vector<8x54xf32> to vector<8x1xf32>
    %8 = vector.broadcast %7 : vector<8x1xf32> to vector<8x768xf32>
    %9 = arith.mulf %6, %8 : vector<8x768xf32>
    %10 = arith.addf %5, %9 : vector<8x768xf32>
    %c17_i32 = arith.constant 17 : i32
    %11 = tpu.dynamic_rotate %0 by %c17_i32 dim 1 : vector<8x768xf32>, i32 -> vector<8x768xf32>
    %12 = vector.extract_strided_slice %1 {offsets = [0, 42], sizes = [8, 1], strides = [1, 1]} : vector<8x54xf32> to vector<8x1xf32>
    %13 = vector.broadcast %12 : vector<8x1xf32> to vector<8x768xf32>
    %14 = arith.mulf %11, %13 : vector<8x768xf32>
    %15 = arith.addf %10, %14 : vector<8x768xf32>
    %c1_i32 = arith.constant 1 : i32
    %16 = tpu.dynamic_rotate %0 by %c1_i32 dim 1 : vector<8x768xf32>, i32 -> vector<8x768xf32>
    %17 = vector.extract_strided_slice %1 {offsets = [0, 43], sizes = [8, 1], strides = [1, 1]} : vector<8x54xf32> to vector<8x1xf32>
    %18 = vector.broadcast %17 : vector<8x1xf32> to vector<8x768xf32>
    %19 = arith.mulf %16, %18 : vector<8x768xf32>
    %20 = arith.addf %15, %19 : vector<8x768xf32>
    %21 = vector.extract_strided_slice %1 {offsets = [0, 44], sizes = [8, 1], strides = [1, 1]} : vector<8x54xf32> to vector<8x1xf32>
    %22 = vector.broadcast %21 : vector<8x1xf32> to vector<8x768xf32>
    %23 = arith.mulf %0, %22 : vector<8x768xf32>
    %24 = arith.addf %20, %23 : vector<8x768xf32>
    %c767_i32 = arith.constant 767 : i32
    %25 = tpu.dynamic_rotate %0 by %c767_i32 dim 1 : vector<8x768xf32>, i32 -> vector<8x768xf32>
    %26 = vector.extract_strided_slice %1 {offsets = [0, 45], sizes = [8, 1], strides = [1, 1]} : vector<8x54xf32> to vector<8x1xf32>
    %27 = vector.broadcast %26 : vector<8x1xf32> to vector<8x768xf32>
    %28 = arith.mulf %25, %27 : vector<8x768xf32>
    %29 = arith.addf %24, %28 : vector<8x768xf32>
    %c751_i32 = arith.constant 751 : i32
    %30 = tpu.dynamic_rotate %0 by %c751_i32 dim 1 : vector<8x768xf32>, i32 -> vector<8x768xf32>
    %31 = vector.extract_strided_slice %1 {offsets = [0, 46], sizes = [8, 1], strides = [1, 1]} : vector<8x54xf32> to vector<8x1xf32>
    %32 = vector.broadcast %31 : vector<8x1xf32> to vector<8x768xf32>
    %33 = arith.mulf %30, %32 : vector<8x768xf32>
    %34 = arith.addf %29, %33 : vector<8x768xf32>
    %c750_i32 = arith.constant 750 : i32
    %35 = tpu.dynamic_rotate %0 by %c750_i32 dim 1 : vector<8x768xf32>, i32 -> vector<8x768xf32>
    %36 = vector.extract_strided_slice %1 {offsets = [0, 47], sizes = [8, 1], strides = [1, 1]} : vector<8x54xf32> to vector<8x1xf32>
    %37 = vector.broadcast %36 : vector<8x1xf32> to vector<8x768xf32>
    %38 = arith.mulf %35, %37 : vector<8x768xf32>
    %39 = arith.addf %34, %38 : vector<8x768xf32>
    %c749_i32 = arith.constant 749 : i32
    %40 = tpu.dynamic_rotate %0 by %c749_i32 dim 1 : vector<8x768xf32>, i32 -> vector<8x768xf32>
    %41 = vector.extract_strided_slice %1 {offsets = [0, 48], sizes = [8, 1], strides = [1, 1]} : vector<8x54xf32> to vector<8x1xf32>
    %42 = vector.broadcast %41 : vector<8x1xf32> to vector<8x768xf32>
    %43 = arith.mulf %40, %42 : vector<8x768xf32>
    %44 = arith.addf %39, %43 : vector<8x768xf32>
    %cst = arith.constant dense<0.000000e+00> : vector<768xf32>
    %45 = vector.multi_reduction <add>, %44, %cst [0] : vector<8x768xf32> to vector<768xf32>
    %46 = vector.shape_cast %45 : vector<768xf32> to vector<1x768xf32>
    %cst_3 = arith.constant 0.000000e+00 : f32
    %47 = vector.broadcast %cst_3 : f32 to vector<1x768xf32>
    %48 = arith.subf %47, %46 : vector<1x768xf32>
    %49 = math.exp %48 : vector<1x768xf32>
    %cst_4 = arith.constant 1.000000e+00 : f32
    %50 = vector.broadcast %cst_4 : f32 to vector<1x768xf32>
    %51 = arith.addf %50, %49 : vector<1x768xf32>
    %52 = tpu.reciprocal %51 {approx = true} : vector<1x768xf32> -> vector<1x768xf32>
    %53 = vector.extract_strided_slice %0 {offsets = [0, 0], sizes = [4, 768], strides = [1, 1]} : vector<8x768xf32> to vector<4x768xf32>
    %54 = vector.broadcast %52 : vector<1x768xf32> to vector<4x768xf32>
    %55 = arith.mulf %54, %53 : vector<4x768xf32>
    %c19_i32_5 = arith.constant 19 : i32
    %56 = tpu.dynamic_rotate %55 by %c19_i32_5 dim 1 : vector<4x768xf32>, i32 -> vector<4x768xf32>
    %c0_6 = arith.constant 0 : index
    %c0_7 = arith.constant 0 : index
    %57 = vector.load %arg3[%c0_6, %c0_7] : memref<40x768xf32, #tpu.memory_space<vmem>>, vector<4x768xf32>
    tpu.vector_store %arg3[%c0_6, %c0_7], %56 {strides = array<i32>} : memref<40x768xf32, #tpu.memory_space<vmem>>, vector<4x768xf32>,
    %c18_i32_8 = arith.constant 18 : i32
    %58 = tpu.dynamic_rotate %55 by %c18_i32_8 dim 1 : vector<4x768xf32>, i32 -> vector<4x768xf32>
    %c4 = arith.constant 4 : index
    %c0_9 = arith.constant 0 : index
    %59 = vector.load %arg3[%c4, %c0_9] : memref<40x768xf32, #tpu.memory_space<vmem>>, vector<4x768xf32>
    tpu.vector_store %arg3[%c4, %c0_9], %58 {strides = array<i32>} : memref<40x768xf32, #tpu.memory_space<vmem>>, vector<4x768xf32>,
    %c17_i32_10 = arith.constant 17 : i32
    %60 = tpu.dynamic_rotate %55 by %c17_i32_10 dim 1 : vector<4x768xf32>, i32 -> vector<4x768xf32>
    %c8 = arith.constant 8 : index
    %c0_11 = arith.constant 0 : index
    %61 = vector.load %arg3[%c8, %c0_11] : memref<40x768xf32, #tpu.memory_space<vmem>>, vector<4x768xf32>
    tpu.vector_store %arg3[%c8, %c0_11], %60 {strides = array<i32>} : memref<40x768xf32, #tpu.memory_space<vmem>>, vector<4x768xf32>,
    %c1_i32_12 = arith.constant 1 : i32
    %62 = tpu.dynamic_rotate %55 by %c1_i32_12 dim 1 : vector<4x768xf32>, i32 -> vector<4x768xf32>
    %c12 = arith.constant 12 : index
    %c0_13 = arith.constant 0 : index
    %63 = vector.load %arg3[%c12, %c0_13] : memref<40x768xf32, #tpu.memory_space<vmem>>, vector<4x768xf32>
    tpu.vector_store %arg3[%c12, %c0_13], %62 {strides = array<i32>} : memref<40x768xf32, #tpu.memory_space<vmem>>, vector<4x768xf32>,
    %c16 = arith.constant 16 : index
    %c0_14 = arith.constant 0 : index
    %64 = vector.load %arg3[%c16, %c0_14] : memref<40x768xf32, #tpu.memory_space<vmem>>, vector<4x768xf32>
    tpu.vector_store %arg3[%c16, %c0_14], %55 {strides = array<i32>} : memref<40x768xf32, #tpu.memory_space<vmem>>, vector<4x768xf32>,
    %c767_i32_15 = arith.constant 767 : i32
    %65 = tpu.dynamic_rotate %55 by %c767_i32_15 dim 1 : vector<4x768xf32>, i32 -> vector<4x768xf32>
    %c20 = arith.constant 20 : index
    %c0_16 = arith.constant 0 : index
    %66 = vector.load %arg3[%c20, %c0_16] : memref<40x768xf32, #tpu.memory_space<vmem>>, vector<4x768xf32>
    tpu.vector_store %arg3[%c20, %c0_16], %65 {strides = array<i32>} : memref<40x768xf32, #tpu.memory_space<vmem>>, vector<4x768xf32>,
    %c751_i32_17 = arith.constant 751 : i32
    %67 = tpu.dynamic_rotate %55 by %c751_i32_17 dim 1 : vector<4x768xf32>, i32 -> vector<4x768xf32>
    %c24 = arith.constant 24 : index
    %c0_18 = arith.constant 0 : index
    %68 = vector.load %arg3[%c24, %c0_18] : memref<40x768xf32, #tpu.memory_space<vmem>>, vector<4x768xf32>
    tpu.vector_store %arg3[%c24, %c0_18], %67 {strides = array<i32>} : memref<40x768xf32, #tpu.memory_space<vmem>>, vector<4x768xf32>,
    %c750_i32_19 = arith.constant 750 : i32
    %69 = tpu.dynamic_rotate %55 by %c750_i32_19 dim 1 : vector<4x768xf32>, i32 -> vector<4x768xf32>
    %c28 = arith.constant 28 : index
    %c0_20 = arith.constant 0 : index
    %70 = vector.load %arg3[%c28, %c0_20] : memref<40x768xf32, #tpu.memory_space<vmem>>, vector<4x768xf32>
    tpu.vector_store %arg3[%c28, %c0_20], %69 {strides = array<i32>} : memref<40x768xf32, #tpu.memory_space<vmem>>, vector<4x768xf32>,
    %c749_i32_21 = arith.constant 749 : i32
    %71 = tpu.dynamic_rotate %55 by %c749_i32_21 dim 1 : vector<4x768xf32>, i32 -> vector<4x768xf32>
    %c32 = arith.constant 32 : index
    %c0_22 = arith.constant 0 : index
    %72 = vector.load %arg3[%c32, %c0_22] : memref<40x768xf32, #tpu.memory_space<vmem>>, vector<4x768xf32>
    tpu.vector_store %arg3[%c32, %c0_22], %71 {strides = array<i32>} : memref<40x768xf32, #tpu.memory_space<vmem>>, vector<4x768xf32>,
    %cst_23 = arith.constant 0.000000e+00 : f32
    %73 = vector.broadcast %cst_23 : f32 to vector<4x768xf32>
    %c36 = arith.constant 36 : index
    %c0_24 = arith.constant 0 : index
    %74 = vector.load %arg3[%c36, %c0_24] : memref<40x768xf32, #tpu.memory_space<vmem>>, vector<4x768xf32>
    tpu.vector_store %arg3[%c36, %c0_24], %73 {strides = array<i32>} : memref<40x768xf32, #tpu.memory_space<vmem>>, vector<4x768xf32>,
    %75 = vector.extract_strided_slice %1 {offsets = [0, 0], sizes = [8, 40], strides = [1, 1]} : vector<8x54xf32> to vector<8x40xf32>
    %c0_25 = arith.constant 0 : index
    %c0_26 = arith.constant 0 : index
    %76 = vector.load %arg3[%c0_25, %c0_26] : memref<40x768xf32, #tpu.memory_space<vmem>>, vector<40x768xf32>
    %cst_27 = arith.constant dense<0.000000e+00> : vector<8x768xf32>
    %77 = tpu.matmul %75, %76, %cst_27 {dimension_numbers = #tpu.dot_dimension_numbers<[1], [0], [0], [1], [0, 0, 1, 1], [], []>} : vector<8x40xf32>, vector<40x768xf32>, vector<8x768xf32> -> vector<8x768xf32>
    %78 = vector.extract_strided_slice %77 {offsets = [0, 0], sizes = [4, 768], strides = [1, 1]} : vector<8x768xf32> to vector<4x768xf32>
    %79 = tpu.iota {dimensions = array<i32: 1>} : vector<1x768xi32>
    %80 = arith.sitofp %79 : vector<1x768xi32> to vector<1x768xf32>
    %cst_28 = arith.constant 5.000000e-01 : f32
    %81 = vector.broadcast %cst_28 : f32 to vector<1x768xf32>
    %82 = arith.addf %80, %81 : vector<1x768xf32>
    %cst_29 = arith.constant 0.00260416674 : f32
    %83 = vector.broadcast %cst_29 : f32 to vector<1x768xf32>
    %84 = arith.mulf %82, %83 : vector<1x768xf32>
    %85 = math.floor %84 : vector<1x768xf32>
    %cst_30 = arith.constant 3.840000e+02 : f32
    %86 = vector.broadcast %cst_30 : f32 to vector<1x768xf32>
    %87 = arith.mulf %86, %85 : vector<1x768xf32>
    %88 = arith.subf %80, %87 : vector<1x768xf32>
    %cst_31 = arith.constant 5.000000e-01 : f32
    %89 = vector.broadcast %cst_31 : f32 to vector<1x768xf32>
    %90 = arith.addf %88, %89 : vector<1x768xf32>
    %cst_32 = arith.constant 0.055555556 : f32
    %91 = vector.broadcast %cst_32 : f32 to vector<1x768xf32>
    %92 = arith.mulf %90, %91 : vector<1x768xf32>
    %93 = math.floor %92 : vector<1x768xf32>
    %cst_33 = arith.constant 1.800000e+01 : f32
    %94 = vector.broadcast %cst_33 : f32 to vector<1x768xf32>
    %95 = arith.mulf %93, %94 : vector<1x768xf32>
    %96 = arith.subf %88, %95 : vector<1x768xf32>
    %cst_34 = arith.constant 1.000000e+00 : f32
    %97 = vector.broadcast %cst_34 : f32 to vector<1x768xf32>
    %98 = arith.cmpf oge, %93, %97 : vector<1x768xf32>
    %cst_35 = arith.constant 1.600000e+01 : f32
    %99 = vector.broadcast %cst_35 : f32 to vector<1x768xf32>
    %100 = arith.cmpf ole, %93, %99 : vector<1x768xf32>
    %101 = arith.andi %98, %100 : vector<1x768xi1>
    %cst_36 = arith.constant 1.000000e+00 : f32
    %102 = vector.broadcast %cst_36 : f32 to vector<1x768xf32>
    %103 = arith.cmpf oge, %96, %102 : vector<1x768xf32>
    %cst_37 = arith.constant 1.600000e+01 : f32
    %104 = vector.broadcast %cst_37 : f32 to vector<1x768xf32>
    %105 = arith.cmpf ole, %96, %104 : vector<1x768xf32>
    %106 = arith.andi %103, %105 : vector<1x768xi1>
    %107 = arith.andi %101, %106 : vector<1x768xi1>
    %108 = arith.extui %107 : vector<1x768xi1> to vector<1x768xi32>
    %109 = arith.sitofp %108 : vector<1x768xi32> to vector<1x768xf32>
    %110 = vector.extract_strided_slice %1 {offsets = [0, 49], sizes = [4, 1], strides = [1, 1]} : vector<8x54xf32> to vector<4x1xf32>
    %111 = vector.extract_strided_slice %1 {offsets = [0, 50], sizes = [4, 1], strides = [1, 1]} : vector<8x54xf32> to vector<4x1xf32>
    %112 = vector.broadcast %109 : vector<1x768xf32> to vector<4x768xf32>
    %113 = arith.mulf %78, %112 : vector<4x768xf32>
    %cst_38 = arith.constant dense<0.000000e+00> : vector<4xf32>
    %114 = vector.multi_reduction <add>, %113, %cst_38 [1] : vector<4x768xf32> to vector<4xf32>
    %115 = vector.shape_cast %114 : vector<4xf32> to vector<4x1xf32>
    %cst_39 = arith.constant 0.001953125 : f32
    %116 = vector.broadcast %cst_39 : f32 to vector<4x1xf32>
    %117 = arith.mulf %115, %116 : vector<4x1xf32>
    %118 = vector.broadcast %117 : vector<4x1xf32> to vector<4x768xf32>
    %119 = arith.subf %78, %118 : vector<4x768xf32>
    %120 = vector.broadcast %109 : vector<1x768xf32> to vector<4x768xf32>
    %121 = arith.mulf %119, %120 : vector<4x768xf32>
    %122 = arith.mulf %121, %121 : vector<4x768xf32>
    %cst_40 = arith.constant dense<0.000000e+00> : vector<4xf32>
    %123 = vector.multi_reduction <add>, %122, %cst_40 [1] : vector<4x768xf32> to vector<4xf32>
    %124 = vector.shape_cast %123 : vector<4xf32> to vector<4x1xf32>
    %cst_41 = arith.constant 0.001953125 : f32
    %125 = vector.broadcast %cst_41 : f32 to vector<4x1xf32>
    %126 = arith.mulf %124, %125 : vector<4x1xf32>
    %cst_42 = arith.constant 9.99999974E-6 : f32
    %127 = vector.broadcast %cst_42 : f32 to vector<4x1xf32>
    %128 = arith.addf %126, %127 : vector<4x1xf32>
    %129 = math.rsqrt %128 : vector<4x1xf32>
    %130 = arith.mulf %129, %110 : vector<4x1xf32>
    %131 = vector.broadcast %130 : vector<4x1xf32> to vector<4x768xf32>
    %132 = arith.mulf %121, %131 : vector<4x768xf32>
    %133 = vector.broadcast %111 : vector<4x1xf32> to vector<4x768xf32>
    %134 = arith.addf %132, %133 : vector<4x768xf32>
    %cst_43 = arith.constant 0.000000e+00 : f32
    %135 = vector.broadcast %cst_43 : f32 to vector<4x768xf32>
    %136 = arith.maximumf %134, %135 : vector<4x768xf32>
    %137 = vector.broadcast %109 : vector<1x768xf32> to vector<4x768xf32>
    %138 = arith.mulf %136, %137 : vector<4x768xf32>
    %139 = vector.extract_strided_slice %138 {offsets = [0, 0], sizes = [4, 384], strides = [1, 1]} : vector<4x768xf32> to vector<4x384xf32>
    %cst_44 = arith.constant dense<0.000000e+00> : vector<4xf32>
    %140 = vector.multi_reduction <add>, %139, %cst_44 [1] : vector<4x384xf32> to vector<4xf32>
    %141 = vector.shape_cast %140 : vector<4xf32> to vector<4x1xf32>
    %cst_45 = arith.constant 3.906250e-03 : f32
    %142 = vector.broadcast %cst_45 : f32 to vector<4x1xf32>
    %143 = arith.mulf %141, %142 : vector<4x1xf32>
    %144 = vector.extract_strided_slice %138 {offsets = [0, 384], sizes = [4, 384], strides = [1, 1]} : vector<4x768xf32> to vector<4x384xf32>
    %cst_46 = arith.constant dense<0.000000e+00> : vector<4xf32>
    %145 = vector.multi_reduction <add>, %144, %cst_46 [1] : vector<4x384xf32> to vector<4xf32>
    %146 = vector.shape_cast %145 : vector<4xf32> to vector<4x1xf32>
    %cst_47 = arith.constant 3.906250e-03 : f32
    %147 = vector.broadcast %cst_47 : f32 to vector<4x1xf32>
    %148 = arith.mulf %146, %147 : vector<4x1xf32>
    %149 = tpu.concatenate %143, %148 in 1 : vector<4x1xf32>, vector<4x1xf32> -> vector<4x2xf32>
    %150 = vector.extract_strided_slice %1 {offsets = [0, 51], sizes = [4, 1], strides = [1, 1]} : vector<8x54xf32> to vector<4x1xf32>
    %151 = vector.extract_strided_slice %1 {offsets = [0, 52], sizes = [4, 1], strides = [1, 1]} : vector<8x54xf32> to vector<4x1xf32>
    %152 = vector.broadcast %150 : vector<4x1xf32> to vector<4x2xf32>
    %153 = arith.mulf %149, %152 : vector<4x2xf32>
    %cst_48 = arith.constant dense<0.000000e+00> : vector<2xf32>
    %154 = vector.multi_reduction <add>, %153, %cst_48 [0] : vector<4x2xf32> to vector<2xf32>
    %155 = vector.shape_cast %154 : vector<2xf32> to vector<1x2xf32>
    %156 = vector.extract_strided_slice %1 {offsets = [0, 53], sizes = [1, 1], strides = [1, 1]} : vector<8x54xf32> to vector<1x1xf32>
    %157 = vector.broadcast %156 : vector<1x1xf32> to vector<1x2xf32>
    %158 = arith.addf %155, %157 : vector<1x2xf32>
    %159 = vector.broadcast %151 : vector<4x1xf32> to vector<4x2xf32>
    %160 = arith.mulf %149, %159 : vector<4x2xf32>
    %cst_49 = arith.constant dense<0.000000e+00> : vector<2xf32>
    %161 = vector.multi_reduction <add>, %160, %cst_49 [0] : vector<4x2xf32> to vector<2xf32>
    %162 = vector.shape_cast %161 : vector<2xf32> to vector<1x2xf32>
    %163 = vector.extract_strided_slice %1 {offsets = [1, 53], sizes = [1, 1], strides = [1, 1]} : vector<8x54xf32> to vector<1x1xf32>
    %164 = vector.broadcast %163 : vector<1x1xf32> to vector<1x2xf32>
    %165 = arith.addf %162, %164 : vector<1x2xf32>
    %166 = arith.maximumf %158, %165 : vector<1x2xf32>
    %167 = arith.subf %158, %166 : vector<1x2xf32>
    %168 = math.exp %167 : vector<1x2xf32>
    %169 = arith.subf %165, %166 : vector<1x2xf32>
    %170 = math.exp %169 : vector<1x2xf32>
    %171 = arith.addf %168, %170 : vector<1x2xf32>
    %cst_50 = arith.constant 1.000000e+00 : f32
    %172 = vector.broadcast %cst_50 : f32 to vector<1x2xf32>
    %173 = arith.divf %172, %171 : vector<1x2xf32>
    %174 = arith.mulf %168, %173 : vector<1x2xf32>
    %175 = arith.mulf %170, %173 : vector<1x2xf32>
    %176 = tpu.concatenate %174, %175 in 0 : vector<1x2xf32>, vector<1x2xf32> -> vector<2x2xf32>
    %c0_51 = arith.constant 0 : index
    %c0_52 = arith.constant 0 : index
    %177 = vector.load %arg2[%c0_51, %c0_52] : memref<2x2xf32, #tpu.memory_space<vmem>>, vector<2x2xf32>
    tpu.vector_store %arg2[%c0_51, %c0_52], %176 {strides = array<i32>} : memref<2x2xf32, #tpu.memory_space<vmem>>, vector<2x2xf32>,
    return
  }
}

</mosaic_0001>

<bundles_post_ra>
// kernel: teem_forward.1
= control target key start
LH: loop header
LB: loop body
LE: loop exit
PB: predicated region body
PF: predicated region fallthrough
CT: control target
= control target key end

     0   :  { %v1280_v0 = vmov 42   ;;  %v1281_v1 = vmov 40   ;;  %v1282_v4 = vmov 41   ;;  %s1283_s13 = smov 19   ;;  %v1284_v6 = vmov 44   ;;  %s1286_s18 = smov 18   ;;  %s2154_s1 = inlined_call_operand.vmem [shape: f32[8,54], index: 1, kind: input, shape index: {}]   ;;  %s2155_s0 = inlined_call_operand.vmem [shape: f32[8,768], index: 0, kind: input, shape index: {}]   ;;  %s2156_s2 = inlined_call_operand.vmem [shape: f32[2,2], index: 2, kind: output, shape index: {}]  }
   0x1   :  { %1234 = vset.pattern.permute.xlu1 %v1280_v0  ;;  %1232 = vset.pattern.permute.xlu0 %v1281_v1  ;;  %v1321_v2 = vld [vmem:[%s2154_s1] sm:$0xff]  ;;  %v1336_v5 = vld [vmem:[%s2155_s0 + $0x8] sm:$0xff]  ;;  %v1341_v7 = vld [vmem:[%s2155_s0 + $0x10] sm:$0xff]  ;;  %v1285_v8 = vmov 43   ;;  %s1287_s21 = smov 17   ;;  %v1288_v10 = vmov 45   ;;  %v30_v39 = vlaneseq }
   0x2   :  { %105 = vperm.xlu1 %1234, %v1321_v2   ;;  %41 = vperm.xlu0 %1232, %v1321_v2   ;;  %v1328_v3 = vld [vmem:[%s2155_s0] sm:$0xff]  ;;  %v1357_v9 = vld [vmem:[%s2155_s0 + $0x28] sm:$0xff]  ;;  %s1289_s22 = smov 1   ;;  %v1290_v11 = vmov 46   ;;  %v1389_v13 = vld [vmem:[%s2155_s0 + $0x18] sm:$0xff]  ;;  %v1291_v14 = vmov 48  }
   0x3   :  { %v1384_v12 = vld [vmem:[%s2155_s0 + $0x20] sm:$0xff]  ;;  %s1292_s27 = smov 127   ;;  %v1293_v15 = vmov 47   ;;  %s1294_s0 = smov 111   ;;  %v1500_v42 = vand.u32 127, %v30_v39  ;;  %vm689_vm8 = vcmask 326656  }
   0x4   :  { %s1295_s28 = smov 110   ;;  %s1296_s29 = smov 109  }
   0x5   :  { %vm62_vm0 = vcmp.lt.s32.totalorder %v1500_v42, 18  ;;  %vm32_vm1 = vcmp.lt.s32.totalorder %v1500_v42, 19  ;;  %vm97_vm2 = vcmp.lt.s32.totalorder %v1500_v42, 17  ;;  %vm132_vm3 = vcmp.lt.s32.totalorder %v1500_v42, 1 }
   0x6   :  { %1233 = vset.pattern.permute.xlu0 %v1282_v4  ;;  %18 = vrot.lane.b32.xlu1 %v1328_v3, %s1283_s13  ;;  %vm183_vm4 = vcmp.lt.s32.totalorder %v1500_v42, 127  ;;  %vm218_vm5 = vcmp.lt.s32.totalorder %v1500_v42, 111  ;;  %vm253_vm6 = vcmp.lt.s32.totalorder %v1500_v42, 110  ;;  %vm288_vm7 = vcmp.lt.s32.totalorder %v1500_v42, 109 }
   0x7   :  { %70 = vperm.xlu0 %1233, %v1321_v2   ;;  %1236 = vset.pattern.permute.xlu1 %v1284_v6 }
   0xa   :  { %20 = vrot.lane.b32.xlu1 %v1336_v5, %s1283_s13 }
   0xb   :  { %22 = vrot.lane.b32.xlu0 %v1341_v7, %s1283_s13 }
   0xc   :  { %1235 = vset.pattern.permute.xlu0 %v1285_v8 }
   0xe   :  { %50 = vrot.lane.b32.xlu1 %v1328_v3, %s1286_s18 }
   0xf   :  { %52 = vrot.lane.b32.xlu0 %v1336_v5, %s1286_s18 }
  0x12   :  { %54 = vrot.lane.b32.xlu1 %v1341_v7, %s1286_s18 }
  0x13   :  { %140 = vperm.xlu0 %1235, %v1321_v2  }
  0x16   :  { %28 = vrot.lane.b32.xlu1 %v1357_v9, %s1283_s13 }
  0x17   :  { %85 = vrot.lane.b32.xlu0 %v1328_v3, %s1287_s21 }
  0x18   :  { %1237 = vset.pattern.permute.xlu0 %v1288_v10 }
  0x1a   :  { %60 = vrot.lane.b32.xlu1 %v1357_v9, %s1286_s18 }
  0x1b   :  { %89 = vrot.lane.b32.xlu0 %v1341_v7, %s1287_s21 }
  0x1e   :  { %87 = vrot.lane.b32.xlu1 %v1336_v5, %s1287_s21 }
  0x1f   :  { %95 = vrot.lane.b32.xlu0 %v1357_v9, %s1287_s21 }
  0x22   :  { %156 = vperm.xlu1 %1236, %v1321_v2  }
  0x23   :  { %122 = vrot.lane.b32.xlu0 %v1336_v5, %s1289_s22 }
  0x26   :  { %120 = vrot.lane.b32.xlu1 %v1328_v3, %s1289_s22 }
  0x27   :  { %191 = vperm.xlu0 %1237, %v1321_v2   ;;  %1238 = vset.pattern.permute.xlu1 %v1290_v11 }
  0x2a   :  { %124 = vrot.lane.b32.xlu1 %v1341_v7, %s1289_s22 }
  0x2b   :  { %130 = vrot.lane.b32.xlu0 %v1357_v9, %s1289_s22 }
  0x2c   :  { %1240 = vset.pattern.permute.xlu0 %v1291_v14 }
  0x2e   :  { %26 = vrot.lane.b32.xlu1 %v1384_v12, %s1283_s13 }
  0x2f   :  { %56 = vrot.lane.b32.xlu0 %v1389_v13, %s1286_s18 }
  0x32   :  { %58 = vrot.lane.b32.xlu1 %v1384_v12, %s1286_s18 }
  0x33   :  { %93 = vrot.lane.b32.xlu0 %v1384_v12, %s1287_s21 }
  0x36   :  { %24 = vrot.lane.b32.xlu1 %v1389_v13, %s1283_s13 }
  0x37   :  { %173 = vrot.lane.b32.xlu0 %v1336_v5, %s1292_s27 }
  0x3a   :  { %226 = vperm.xlu1 %1238, %v1321_v2  }
  0x3b   :  { %177 = vrot.lane.b32.xlu0 %v1389_v13, %s1292_s27 }
  0x3e   :  { %91 = vrot.lane.b32.xlu1 %v1389_v13, %s1287_s21 }
  0x3f   :  { %128 = vrot.lane.b32.xlu0 %v1384_v12, %s1289_s22  ;;  %1239 = vset.pattern.permute.xlu1 %v1293_v15 }
  0x42   :  { %175 = vrot.lane.b32.xlu1 %v1341_v7, %s1292_s27 }
  0x43   :  { %126 = vrot.lane.b32.xlu0 %v1389_v13, %s1289_s22 }
  0x46   :  { %261 = vperm.xlu1 %1239, %v1321_v2  }
  0x47   :  { %210 = vrot.lane.b32.xlu0 %v1341_v7, %s1294_s0 }
  0x4a   :  { %171 = vrot.lane.b32.xlu1 %v1328_v3, %s1292_s27 }
  0x4b   :  { %296 = vperm.xlu0 %1240, %v1321_v2  }
  0x4e   :  { %208 = vrot.lane.b32.xlu1 %v1336_v5, %s1294_s0 }
  0x4f   :  { %245 = vrot.lane.b32.xlu0 %v1341_v7, %s1295_s28 }
  0x52   :  { %212 = vrot.lane.b32.xlu1 %v1389_v13, %s1294_s0 }
  0x53   :  { %181 = vrot.lane.b32.xlu0 %v1357_v9, %s1292_s27 }
  0x56   :  { %206 = vrot.lane.b32.xlu1 %v1328_v3, %s1294_s0 }
  0x57   :  { %179 = vrot.lane.b32.xlu0 %v1384_v12, %s1292_s27 }
  0x5a   :  { %243 = vrot.lane.b32.xlu1 %v1336_v5, %s1295_s28 }
  0x5b   :  { %280 = vrot.lane.b32.xlu0 %v1341_v7, %s1296_s29 }
  0x5e   :  { %247 = vrot.lane.b32.xlu1 %v1389_v13, %s1295_s28 }
  0x5f   :  { %216 = vrot.lane.b32.xlu0 %v1357_v9, %s1294_s0 }
  0x62   :  { %241 = vrot.lane.b32.xlu1 %v1328_v3, %s1295_s28 }
  0x63   :  { %214 = vrot.lane.b32.xlu0 %v1384_v12, %s1294_s0 }
  0x66   :  { %278 = vrot.lane.b32.xlu1 %v1336_v5, %s1296_s29 }
  0x67   :  { %249 = vrot.lane.b32.xlu0 %v1384_v12, %s1295_s28 }
  0x6a   :  { %282 = vrot.lane.b32.xlu1 %v1389_v13, %s1296_s29 }
  0x6b   :  { %284 = vrot.lane.b32.xlu0 %v1384_v12, %s1296_s29 }
  0x6e   :  { %276 = vrot.lane.b32.xlu1 %v1328_v3, %s1296_s29 }
  0x72   :  { %251 = vrot.lane.b32.xlu1 %v1357_v9, %s1295_s28 }
  0x76   :  { %286 = vrot.lane.b32.xlu1 %v1357_v9, %s1296_s29 }
  0x7d   :  { %v1458_v16 = vpop.permute.xlu1 %105  ;;  %v1460_v17 = vpop.permute.xlu0 %41 }
  0x81   :  { %v1462_v18 = vpop.permute.xlu1 %18 }
  0x82   :  { %v1464_v19 = vpop.permute.xlu0 %70 }
  0x85   :  { %v1466_v20 = vpop.permute.xlu1 %20 }
  0x86   :  { %v1468_v21 = vpop.permute.xlu0 %22 }
  0x89   :  { %v1470_v22 = vpop.permute.xlu1 %50 }
  0x8a   :  { %v1472_v23 = vpop.permute.xlu0 %52 }
  0x8d   :  { %v1474_v24 = vpop.permute.xlu1 %54 }
  0x8e   :  { %v1476_v25 = vpop.permute.xlu0 %140 }
  0x91   :  { %v29_v26 = vpop.permute.xlu1 %28 }
  0x92   :  { %v1478_v27 = vpop.permute.xlu0 %85  ;;  %v38_v57 = vsel %vm32_vm1, %v29_v26, %v1462_v18 }
  0x93   :  { %v44_v1 = vmul.f32 %v1460_v17, %v38_v57  ;;  %v37_v57 = vsel %vm32_vm1, %v1462_v18, %v1466_v20 }
  0x95   :  { %v61_v28 = vpop.permute.xlu1 %60 }
  0x96   :  { %v1480_v29 = vpop.permute.xlu0 %89  ;;  %v68_v53 = vsel %vm62_vm0, %v61_v28, %v1470_v22 }
  0x97   :  { %v73_v60 = vmul.f32 %v1464_v19, %v68_v53 }
  0x99   :  { %v1482_v30 = vpop.permute.xlu1 %87  ;;  %v79_v10 = vadd.f32 %v73_v60, %v44_v1 }
  0x9a   :  { %v96_v31 = vpop.permute.xlu0 %95 }
  0x9b   :  { %v103_v58 = vsel %vm97_vm2, %v96_v31, %v1478_v27 }
  0x9c   :  { %v108_v2 = vmul.f32 %v1458_v16, %v103_v58 }
  0x9d   :  { %v1484_v32 = vpop.permute.xlu1 %156 }
  0x9e   :  { %v1486_v33 = vpop.permute.xlu0 %122  ;;  %v114_v14 = vadd.f32 %v108_v2, %v79_v10  ;;  %v164_v60 = vmul.f32 %v1484_v32, %v1357_v9  ;;  %v45_v2 = vmul.f32 %v1460_v17, %v37_v57 }
  0xa1   :  { %v1488_v34 = vpop.permute.xlu1 %120 }
  0xa2   :  { %v1490_v35 = vpop.permute.xlu0 %191 }
  0xa5   :  { %v1492_v36 = vpop.permute.xlu1 %124 }
  0xa6   :  { %v131_v37 = vpop.permute.xlu0 %130 }
  0xa7   :  { %v138_v62 = vsel %vm132_vm3, %v131_v37, %v1488_v34 }
  0xa8   :  { %v143_v11 = vmul.f32 %v1476_v25, %v138_v62  ;;  %v66_v62 = vsel %vm62_vm0, %v1472_v23, %v1474_v24 }
  0xa9   :  { %v1494_v38 = vpop.permute.xlu1 %26 }
  0xaa   :  { %v1496_v40 = vpop.permute.xlu0 %56  ;;  %v33_v47 = vsel %vm32_vm1, %v1494_v38, %v29_v26 }
  0xab   :  { %v49_v51 = vmul.f32 %v1460_v17, %v33_v47 }
  0xad   :  { %v1498_v41 = vpop.permute.xlu1 %58 }
  0xae   :  { %v1502_v43 = vpop.permute.xlu0 %93  ;;  %v63_v44 = vsel %vm62_vm0, %v1498_v41, %v61_v28  ;;  %v149_v28 = vadd.f32 %v143_v11, %v114_v14  ;;  %v75_v11 = vmul.f32 %v1464_v19, %v66_v62 }
  0xaf   :  { %v78_v48 = vmul.f32 %v1464_v19, %v63_v44  ;;  %v98_v49 = vsel %vm97_vm2, %v1502_v43, %v96_v31  ;;  %v159_v31 = vmul.f32 %v1484_v32, %v1328_v3 }
  0xb0   :  { %v113_v55 = vmul.f32 %v1458_v16, %v98_v49 }
  0xb1   :  { %v1508_v45 = vpop.permute.xlu1 %24  ;;  %v84_v54 = vadd.f32 %v78_v48, %v49_v51  ;;  %v165_v47 = vadd.f32 %v159_v31, %v149_v28 }
  0xb2   :  { %v1511_v46 = vpop.permute.xlu0 %173 }
  0xb3   :  { %v119_v63 = vadd.f32 %v113_v55, %v84_v54  ;;  %v67_v54 = vsel %vm62_vm0, %v1470_v22, %v1472_v23  ;;  %v102_v22 = vsel %vm97_vm2, %v1478_v27, %v1482_v30  ;;  %v101_v23 = vsel %vm97_vm2, %v1482_v30, %v1480_v29 }
  0xb4   :  { %v137_v27 = vsel %vm132_vm3, %v1488_v34, %v1486_v33  ;;  %v136_v34 = vsel %vm132_vm3, %v1486_v33, %v1492_v36 }
  0xb5   :  { %v1521_v50 = vpop.permute.xlu1 %226 }
  0xb6   :  { %v1524_v52 = vpop.permute.xlu0 %177 }
  0xb9   :  { %v1530_v56 = vpop.permute.xlu1 %91 }
  0xba   :  { %v1539_v59 = vpop.permute.xlu0 %128 }
  0xbb   :  { %v133_v61 = vsel %vm132_vm3, %v1539_v59, %v131_v37 }
  0xbc   :  { %v148_v0 = vmul.f32 %v1476_v25, %v133_v61  ;;  %v74_v61 = vmul.f32 %v1464_v19, %v67_v54 }
  0xbd   :  { %v1551_v4 = vpop.permute.xlu1 %175 }
  0xbe   :  { %v154_v6 = vadd.f32 %v148_v0, %v119_v63  ;;  %v1553_v8 = vpop.permute.xlu0 %126  ;;  %v36_v63 = vsel %vm32_vm1, %v1466_v20, %v1468_v21  ;;  %v109_v20 = vmul.f32 %v1458_v16, %v102_v22  ;;  %v80_v31 = vadd.f32 %v74_v61, %v45_v2 }
  0xbf   :  { %v46_v30 = vmul.f32 %v1460_v17, %v36_v63  ;;  %v135_v61 = vsel %vm132_vm3, %v1492_v36, %v1553_v8  ;;  %v187_v63 = vsel %vm183_vm4, %v1511_v46, %v1551_v4  ;;  %v34_v36 = vsel %vm32_vm1, %v1508_v45, %v1494_v38 }
  0xc0   :  { %v170_v0 = vadd.f32 %v164_v60, %v154_v6  ;;  %v35_v6 = vsel %vm32_vm1, %v1468_v21, %v1508_v45  ;;  %v65_v21 = vsel %vm62_vm0, %v1474_v24, %v1496_v40  ;;  %v115_v33 = vadd.f32 %v109_v20, %v80_v31 }
  0xc1   :  { %v1556_v15 = vpop.permute.xlu1 %261  ;;  %v81_v57 = vadd.f32 %v75_v11, %v46_v30  ;;  %v145_v60 = vmul.f32 %v1476_v25, %v136_v34  ;;  %v76_v24 = vmul.f32 %v1464_v19, %v65_v21  ;;  %v146_v2 = vmul.f32 %v1476_v25, %v135_v61 }
  0xc2   :  { %v1558_v26 = vpop.permute.xlu0 %210  ;;  %v64_v38 = vsel %vm62_vm0, %v1496_v40, %v1498_v41  ;;  %v48_v30 = vmul.f32 %v1460_v17, %v34_v36 }
  0xc5   :  { %v172_v37 = vpop.permute.xlu1 %171 }
  0xc6   :  { %v188_v39 = vsel %vm183_vm4, %v172_v37, %v1511_v46  ;;  %v1566_v44 = vpop.permute.xlu0 %296  ;;  %v160_v46 = vmul.f32 %v1484_v32, %v1336_v5 }
  0xc7   :  { %v194_v48 = vmul.f32 %v1490_v35, %v188_v39  ;;  %v144_v39 = vmul.f32 %v1476_v25, %v137_v27 }
  0xc9   :  { %v1569_v49 = vadd.f32 %v194_v48, %v165_v47  ;;  %v1571_v51 = vpop.permute.xlu1 %208  ;;  %v100_v47 = vsel %vm97_vm2, %v1480_v29, %v1530_v56  ;;  %v47_v48 = vmul.f32 %v1460_v17, %v35_v6  ;;  %v195_v6 = vmul.f32 %v1490_v35, %v187_v63 }
  0xca   :  { %v1573_v53 = vpop.permute.xlu0 %245  ;;  %v111_v22 = vmul.f32 %v1458_v16, %v100_v47  ;;  %v222_v11 = vsel %vm218_vm5, %v1571_v51, %v1558_v26  ;;  %v77_v47 = vmul.f32 %v1464_v19, %v64_v38 }
  0xcb   :  { %v230_v21 = vmul.f32 %v1521_v50, %v222_v11 }
  0xcd   :  { %v1579_v55 = vpop.permute.xlu1 %212 }
  0xce   :  { %v1585_v58 = vpop.permute.xlu0 %181  ;;  %v221_v40 = vsel %vm218_vm5, %v1558_v26, %v1579_v55 }
  0xcf   :  { %v189_v18 = vsel %vm183_vm4, %v1585_v58, %v172_v37  ;;  %v110_v37 = vmul.f32 %v1458_v16, %v101_v23 }
  0xd0   :  { %v199_v1 = vmul.f32 %v1490_v35, %v189_v18  ;;  %v150_v18 = vadd.f32 %v144_v39, %v115_v33  ;;  %v162_v33 = vmul.f32 %v1484_v32, %v1389_v13 }
  0xd1   :  { %v1615_v10 = vpop.permute.xlu1 %206  ;;  %v116_v29 = vadd.f32 %v110_v37, %v81_v57 }
  0xd2   :  { %v1623_v14 = vadd.f32 %v199_v1, %v170_v0  ;;  %v1625_v28 = vpop.permute.xlu0 %179  ;;  %v82_v0 = vadd.f32 %v76_v24, %v47_v48  ;;  %v186_v1 = vsel %vm183_vm4, %v1551_v4, %v1524_v52  ;;  %v161_v4 = vmul.f32 %v1484_v32, %v1341_v7 }
  0xd3   :  { %v151_v27 = vadd.f32 %v145_v60, %v116_v29  ;;  %v166_v31 = vadd.f32 %v160_v46, %v150_v18  ;;  %v196_v34 = vmul.f32 %v1490_v35, %v186_v1  ;;  %v185_v17 = vsel %vm183_vm4, %v1524_v52, %v1625_v28 }
  0xd4   :  { %v117_v45 = vadd.f32 %v111_v22, %v82_v0  ;;  %v99_v48 = vsel %vm97_vm2, %v1530_v56, %v1502_v43  ;;  %v83_v24 = vadd.f32 %v77_v47, %v48_v30  ;;  %v134_v43 = vsel %vm132_vm3, %v1553_v8, %v1539_v59 }
  0xd5   :  { %v1643_v54 = vpop.permute.xlu1 %243  ;;  %v167_v57 = vadd.f32 %v161_v4, %v151_v27  ;;  %v201_v26 = vadd.f32 %v195_v6, %v166_v31  ;;  %v231_v56 = vmul.f32 %v1521_v50, %v221_v40  ;;  %v197_v22 = vmul.f32 %v1490_v35, %v185_v17 }
  0xd6   :  { %v1650_v62 = vpop.permute.xlu0 %280  ;;  %v257_v37 = vsel %vm253_vm6, %v1643_v54, %v1573_v53  ;;  %v152_v39 = vadd.f32 %v146_v2, %v117_v45  ;;  %v112_v29 = vmul.f32 %v1458_v16, %v99_v48  ;;  %v147_v16 = vmul.f32 %v1476_v25, %v134_v43 }
  0xd7   :  { %v265_v61 = vmul.f32 %v1556_v15, %v257_v37  ;;  %v202_v18 = vadd.f32 %v196_v34, %v167_v57  ;;  %v236_v63 = vadd.f32 %v230_v21, %v201_v26  ;;  %v184_v31 = vsel %vm183_vm4, %v1625_v28, %v1585_v58 }
  0xd8   :  { %v168_v36 = vadd.f32 %v162_v33, %v152_v39  ;;  %v118_v4 = vadd.f32 %v112_v29, %v83_v24  ;;  %v163_v48 = vmul.f32 %v1484_v32, %v1384_v12 }
  0xd9   :  { %v248_v23 = vpop.permute.xlu1 %247  ;;  %v271_v2 = vadd.f32 %v265_v61, %v236_v63  ;;  %v237_v11 = vadd.f32 %v231_v56, %v202_v18 }
  0xda   :  { %v1675_v20 = vpop.permute.xlu0 %216  ;;  %v256_v52 = vsel %vm253_vm6, %v1573_v53, %v248_v23  ;;  %v203_v38 = vadd.f32 %v197_v22, %v168_v36  ;;  %v153_v47 = vadd.f32 %v147_v16, %v118_v4 }
  0xdb   :  { %v266_v0 = vmul.f32 %v1556_v15, %v256_v52  ;;  %v198_v52 = vmul.f32 %v1490_v35, %v184_v31 }
  0xdd   :  { %v1700_v41 = vpop.permute.xlu1 %241 }
  0xde   :  { %v215_v60 = vpop.permute.xlu0 %214 }
  0xdf   :  { %v220_v19 = vsel %vm218_vm5, %v1579_v55, %v215_v60  ;;  %v223_v55 = vsel %vm218_vm5, %v1615_v10, %v1571_v51  ;;  %v258_v51 = vsel %vm253_vm6, %v1700_v41, %v1643_v54 }
  0xe0   :  { %v232_v1 = vmul.f32 %v1521_v50, %v220_v19  ;;  %v229_v6 = vmul.f32 %v1521_v50, %v223_v55  ;;  %v264_v54 = vmul.f32 %v1556_v15, %v258_v51  ;;  %v224_v19 = vsel %vm218_vm5, %v1675_v20, %v1615_v10 }
  0xe1   :  { %v279_v53 = vpop.permute.xlu1 %278  ;;  %v234_v35 = vmul.f32 %v1521_v50, %v224_v19 }
  0xe2   :  { %v292_v59 = vsel %vm288_vm7, %v279_v53, %v1650_v62  ;;  %v250_v8 = vpop.permute.xlu0 %249  ;;  %v238_v34 = vadd.f32 %v232_v1, %v203_v38  ;;  %v235_v57 = vadd.f32 %v229_v6, %v1569_v49 }
  0xe3   :  { %v300_v27 = vmul.f32 %v1566_v44, %v292_v59  ;;  %v255_v46 = vsel %vm253_vm6, %v248_v23, %v250_v8  ;;  %v272_v23 = vadd.f32 %v266_v0, %v237_v11  ;;  %v240_v38 = vadd.f32 %v234_v35, %v1623_v14 }
  0xe4   :  { %v267_v45 = vmul.f32 %v1556_v15, %v255_v46  ;;  %v270_v43 = vadd.f32 %v264_v54, %v235_v57 }
  0xe5   :  { %v306_v30 = vadd.f32 %v300_v27, %v271_v2  ;;  %v283_v25 = vpop.permute.xlu1 %282 }
  0xe6   :  { %v291_v37 = vsel %vm288_vm7, %v1650_v62, %v283_v25  ;;  %v285_v39 = vpop.permute.xlu0 %284  ;;  %v273_v58 = vadd.f32 %v267_v45, %v238_v34  ;;  %v219_v62 = vsel %vm218_vm5, %v215_v60, %v1675_v20  ;;  %v169_v60 = vadd.f32 %v163_v48, %v153_v47 }
  0xe7   :  { %v317_v21 = vrot.slane %v306_v30, 4  ;;  %v301_v40 = vmul.f32 %v1566_v44, %v291_v37  ;;  %v290_v17 = vsel %vm288_vm7, %v283_v25, %v285_v39  ;;  %v233_v29 = vmul.f32 %v1521_v50, %v219_v62 }
  0xe8   :  { %v302_v28 = vmul.f32 %v1566_v44, %v290_v17  ;;  %v204_v10 = vadd.f32 %v198_v52, %v169_v60 }
  0xe9   :  { %v318_v33 = vadd.f32 %v317_v21, %v306_v30  ;;  %v307_v26 = vadd.f32 %v301_v40, %v272_v23  ;;  %v277_v61 = vpop.permute.xlu1 %276 }
  0xea   :  { %v308_v32 = vadd.f32 %v302_v28, %v273_v58  ;;  %v293_v24 = vsel %vm288_vm7, %v277_v61, %v279_v53  ;;  %v239_v46 = vadd.f32 %v233_v29, %v204_v10 }
  0xeb   :  { %v319_v49 = vrot.slane %v318_v33, 2  ;;  %v323_v56 = vrot.slane %v307_v26, 4  ;;  %v299_v22 = vmul.f32 %v1566_v44, %v293_v24 }
  0xec   :  { %v329_v18 = vrot.slane %v308_v32, 4 }
  0xed   :  { %v320_v63 = vadd.f32 %v319_v49, %v318_v33  ;;  %v324_v36 = vadd.f32 %v323_v56, %v307_v26  ;;  %v305_v55 = vadd.f32 %v299_v22, %v270_v43  ;;  %v252_v0 = vpop.permute.xlu1 %251 }
  0xee   :  { %v330_v20 = vadd.f32 %v329_v18, %v308_v32  ;;  %v254_v53 = vsel %vm253_vm6, %v250_v8, %v252_v0  ;;  %v259_v1 = vsel %vm253_vm6, %v252_v0, %v1700_v41 }
  0xef   :  { %v321_v59 = vrot.slane %v320_v63, 1  ;;  %v325_v16 = vrot.slane %v324_v36, 2  ;;  %v311_v2 = vrot.slane %v305_v55, 4  ;;  %v268_v27 = vmul.f32 %v1556_v15, %v254_v53 }
  0xf0   :  { %v331_v50 = vrot.slane %v330_v20, 2  ;;  %v269_v11 = vmul.f32 %v1556_v15, %v259_v1 }
  0xf1   :  { %v322_v51 = vadd.f32 %v321_v59, %v320_v63  ;;  %v326_v45 = vadd.f32 %v325_v16, %v324_v36  ;;  %v312_v4 = vadd.f32 %v311_v2, %v305_v55  ;;  %v287_v6 = vpop.permute.xlu1 %286  ;;  %v274_v30 = vadd.f32 %v268_v27, %v239_v46 }
  0xf2   :  { %v332_v8 = vadd.f32 %v331_v50, %v330_v20  ;;  %v289_v41 = vsel %vm288_vm7, %v285_v39, %v287_v6  ;;  %v294_v25 = vsel %vm288_vm7, %v287_v6, %v277_v61  ;;  %v275_v54 = vadd.f32 %v269_v11, %v240_v38 }
  0xf3   :  { %v348_v31 = vsub.f32 0.0, %v322_v51  ;;  %v327_v23 = vrot.slane %v326_v45, 1  ;;  %v313_v34 = vrot.slane %v312_v4, 2  ;;  %v303_v37 = vmul.f32 %v1566_v44, %v289_v41 }
  0xf4   :  { %v333_v15 = vrot.slane %v332_v8, 1  ;;  %v304_v14 = vmul.f32 %v1566_v44, %v294_v25  ;;  %v1297_v38 = vmov 0.0  }
  0xf5   :  { %v355_v21 = vmul.f32 1.442695, %v348_v31  ;;  %v328_v40 = vadd.f32 %v327_v23, %v326_v45  ;;  %v314_v17 = vadd.f32 %v313_v34, %v312_v4  ;;  %v309_v47 = vadd.f32 %v303_v37, %v274_v30  ;;  %654 = vst [vmem:[#allocation2 + $0xd0] sm:$0xf0] %v1297_v38  ;;  %653 = vst [vmem:[#allocation2 + $0x58] sm:$0xf0] %v1297_v38 }
  0xf6   :  { %v334_v48 = vadd.f32 %v333_v15, %v332_v8  ;;  %v310_v58 = vadd.f32 %v304_v14, %v275_v54  ;;  %655 = vst [vmem:[#allocation2 + $0x98] sm:$0xf0] %v1297_v38  ;;  %656 = vst [vmem:[#allocation2 + $0xc8] sm:$0xf0] %v1297_v38  ;;  %756 = vmatprep.mubr.f32.mxu0 %v1297_v38  ;;  %827 = vmatprep.mubr.f32.mxu1 %v1297_v38 }
  0xf7   :  { %1247 = vpow2.f32 %v355_v21  ;;  %v349_v39 = vsub.f32 0.0, %v328_v40  ;;  %v315_v28 = vrot.slane %v314_v17, 1  ;;  %v335_v57 = vrot.slane %v309_v47, 4  ;;  %657 = vst [vmem:[#allocation2 + $0xe0] sm:$0xf0] %v1297_v38 }
  0xf8   :  { %v350_v62 = vsub.f32 0.0, %v334_v48  ;;  %v341_v33 = vrot.slane %v310_v58, 4  ;;  %658 = vst [vmem:[#allocation2 + $0x20] sm:$0xf0] %v1297_v38 }
  0xf9   :  { %v357_v26 = vmul.f32 1.442695, %v349_v39  ;;  %v316_v61 = vadd.f32 %v315_v28, %v314_v17  ;;  %v336_v52 = vadd.f32 %v335_v57, %v309_v47 }
  0xfa   :  { %v359_v19 = vmul.f32 1.442695, %v350_v62  ;;  %v342_v32 = vadd.f32 %v341_v33, %v310_v58 }
  0xfb   :  { %1249 = vpow2.f32 %v357_v26  ;;  %v347_v24 = vsub.f32 0.0, %v316_v61  ;;  %v337_v44 = vrot.slane %v336_v52, 2 }
  0xfc   :  { %1251 = vpow2.f32 %v359_v19  ;;  %v343_v43 = vrot.slane %v342_v32, 2 }
  0xfd   :  { %v353_v49 = vmul.f32 1.442695, %v347_v24  ;;  %v338_v56 = vadd.f32 %v337_v44, %v336_v52 }
  0xfe   :  { %v344_v22 = vadd.f32 %v343_v43, %v342_v32 }
  0xff   :  { %1253 = vpow2.f32 %v353_v49  ;;  %v339_v60 = vrot.slane %v338_v56, 1 }
 0x100   :  { %v345_v29 = vrot.slane %v344_v22, 1 }
 0x101   :  { %v340_v18 = vadd.f32 %v339_v60, %v338_v56 }
 0x102   :  { %v346_v35 = vadd.f32 %v345_v29, %v344_v22 }
 0x103   :  { %v351_v63 = vsub.f32 0.0, %v340_v18 }
 0x104   :  { %v1248_v36 = vpop.eup %1247  ;;  %v352_v55 = vsub.f32 0.0, %v346_v35 }
 0x105   :  { %v366_v0 = vadd.f32 1.0, %v1248_v36  ;;  %v361_v10 = vmul.f32 1.442695, %v351_v63 }
 0x106   :  { %v363_v20 = vmul.f32 1.442695, %v352_v55 }
 0x107   :  { %1255 = vrcp.f32 %v366_v0 }
 0x108   :  { %v1250_v53 = vpop.eup %1249  ;;  %1257 = vpow2.f32 %v361_v10 }
 0x109   :  { %v1252_v1 = vpop.eup %1251  ;;  %v367_v59 = vadd.f32 1.0, %v1250_v53  ;;  %1259 = vpow2.f32 %v363_v20 }
 0x10a   :  { %v368_v16 = vadd.f32 1.0, %v1252_v1 }
 0x10b   :  { %1261 = vrcp.f32 %v367_v59 }
 0x10c   :  { %v1254_v2 = vpop.eup %1253  ;;  %1263 = vrcp.f32 %v368_v16 }
 0x10d   :  { %v365_v27 = vadd.f32 1.0, %v1254_v2 }
 0x10f   :  { %1265 = vrcp.f32 %v365_v27 }
 0x114   :  { %v1256_v46 = vpop.eup %1255 }
 0x115   :  { %v1258_v50 = vpop.eup %1257  ;;  %v378_v11 = vmul.f32 %v1256_v46, %v1336_v5 }
 0x116   :  { %v1260_v51 = vpop.eup %1259  ;;  %v369_v45 = vadd.f32 1.0, %v1258_v50 }
 0x117   :  { %516 = vst [vmem:[#allocation2 + $0xa8] sm:$0xf] %v378_v11  ;;  %v370_v5 = vadd.f32 1.0, %v1260_v51  ;;  %589 = vrot.lane.b32.xlu1 %v378_v11, %s1295_s28 }
 0x118   :  { %v1262_v4 = vpop.eup %1261  ;;  %1267 = vrcp.f32 %v369_v45 }
 0x119   :  { %v1264_v6 = vpop.eup %1263  ;;  %v379_v8 = vmul.f32 %v1262_v4, %v1341_v7  ;;  %1269 = vrcp.f32 %v370_v5 }
 0x11a   :  { %v380_v30 = vmul.f32 %v1264_v6, %v1389_v13 }
 0x11b   :  { %517 = vst [vmem:[#allocation2 + $0x70] sm:$0xf] %v379_v8  ;;  %631 = vrot.lane.b32.xlu1 %v378_v11, %s1296_s29  ;;  %591 = vrot.lane.b32.xlu0 %v379_v8, %s1295_s28 }
 0x11c   :  { %v1266_v41 = vpop.eup %1265  ;;  %518 = vst [vmem:[#allocation2 + $0x40] sm:$0xf] %v380_v30 }
 0x11d   :  { %v377_v25 = vmul.f32 %v1266_v41, %v1328_v3 }
 0x11f   :  { %515 = vst [vmem:[#allocation2 + $0x60] sm:$0xf] %v377_v25  ;;  %633 = vrot.lane.b32.xlu0 %v379_v8, %s1296_s29  ;;  %587 = vrot.lane.b32.xlu1 %v377_v25, %s1295_s28 }
 0x123   :  { %629 = vrot.lane.b32.xlu0 %v377_v25, %s1296_s29  ;;  %523 = vrot.lane.b32.xlu1 %v378_v11, %s1292_s27 }
 0x125   :  { %v1268_v7 = vpop.eup %1267 }
 0x126   :  { %v1270_v13 = vpop.eup %1269  ;;  %v381_v31 = vmul.f32 %v1268_v7, %v1384_v12 }
 0x127   :  { %v382_v23 = vmul.f32 %v1270_v13, %v1357_v9  ;;  %525 = vrot.lane.b32.xlu0 %v379_v8, %s1292_s27  ;;  %565 = vrot.lane.b32.xlu1 %v378_v11, %s1294_s0 }
 0x128   :  { %519 = vst [vmem:[#allocation2 + $0x8] sm:$0xf] %v381_v31 }
 0x129   :  { %520 = vst [vmem:[#allocation2 + $0x78] sm:$0xf] %v382_v23 }
 0x12b   :  { %567 = vrot.lane.b32.xlu0 %v379_v8, %s1294_s0  ;;  %521 = vrot.lane.b32.xlu1 %v377_v25, %s1292_s27 }
 0x12f   :  { %563 = vrot.lane.b32.xlu0 %v377_v25, %s1294_s0  ;;  %473 = vrot.lane.b32.xlu1 %v377_v25, %s1289_s22 }
 0x133   :  { %475 = vrot.lane.b32.xlu0 %v378_v11, %s1289_s22  ;;  %483 = vrot.lane.b32.xlu1 %v382_v23, %s1289_s22 }
 0x137   :  { %407 = vrot.lane.b32.xlu0 %v377_v25, %s1286_s18  ;;  %409 = vrot.lane.b32.xlu1 %v378_v11, %s1286_s18 }
 0x13b   :  { %449 = vrot.lane.b32.xlu0 %v377_v25, %s1287_s21  ;;  %451 = vrot.lane.b32.xlu1 %v378_v11, %s1287_s21 }
 0x13f   :  { %593 = vrot.lane.b32.xlu0 %v380_v30, %s1295_s28  ;;  %595 = vrot.lane.b32.xlu1 %v381_v31, %s1295_s28 }
 0x143   :  { %635 = vrot.lane.b32.xlu0 %v380_v30, %s1296_s29  ;;  %637 = vrot.lane.b32.xlu1 %v381_v31, %s1296_s29 }
 0x147   :  { %417 = vrot.lane.b32.xlu0 %v382_v23, %s1286_s18  ;;  %459 = vrot.lane.b32.xlu1 %v382_v23, %s1287_s21 }
 0x14b   :  { %383 = vrot.lane.b32.xlu0 %v377_v25, %s1283_s13  ;;  %385 = vrot.lane.b32.xlu1 %v378_v11, %s1283_s13 }
 0x14f   :  { %527 = vrot.lane.b32.xlu0 %v380_v30, %s1292_s27  ;;  %529 = vrot.lane.b32.xlu1 %v381_v31, %s1292_s27 }
 0x153   :  { %569 = vrot.lane.b32.xlu0 %v380_v30, %s1294_s0  ;;  %571 = vrot.lane.b32.xlu1 %v381_v31, %s1294_s0 }
 0x157   :  { %393 = vrot.lane.b32.xlu0 %v382_v23, %s1283_s13  ;;  %477 = vrot.lane.b32.xlu1 %v379_v8, %s1289_s22 }
 0x15b   :  { %479 = vrot.lane.b32.xlu0 %v380_v30, %s1289_s22  ;;  %597 = vrot.lane.b32.xlu1 %v382_v23, %s1295_s28 }
 0x15f   :  { %639 = vrot.lane.b32.xlu0 %v382_v23, %s1296_s29  ;;  %411 = vrot.lane.b32.xlu1 %v379_v8, %s1286_s18 }
 0x163   :  { %413 = vrot.lane.b32.xlu0 %v380_v30, %s1286_s18  ;;  %453 = vrot.lane.b32.xlu1 %v379_v8, %s1287_s21 }
 0x167   :  { %455 = vrot.lane.b32.xlu0 %v380_v30, %s1287_s21  ;;  %531 = vrot.lane.b32.xlu1 %v382_v23, %s1292_s27 }
 0x16b   :  { %573 = vrot.lane.b32.xlu0 %v382_v23, %s1294_s0  ;;  %387 = vrot.lane.b32.xlu1 %v379_v8, %s1283_s13 }
 0x16f   :  { %389 = vrot.lane.b32.xlu0 %v380_v30, %s1283_s13  ;;  %481 = vrot.lane.b32.xlu1 %v381_v31, %s1289_s22 }
 0x173   :  { %415 = vrot.lane.b32.xlu0 %v381_v31, %s1286_s18  ;;  %457 = vrot.lane.b32.xlu1 %v381_v31, %s1287_s21 }
 0x177   :  { %391 = vrot.lane.b32.xlu0 %v381_v31, %s1283_s13 }
 0x189   :  { %v590_v3 = vpop.permute.xlu1 %589 }
 0x18d   :  { %v1846_v9 = vpop.permute.xlu0 %591  ;;  %v632_v12 = vpop.permute.xlu1 %631 }
 0x18e   :  { %v602_v34 = vsel %vm253_vm6, %v590_v3, %v1846_v9 }
 0x18f   :  { %v612_v37 = vrot.slane %v602_v34, 4 }
 0x191   :  { %624 = vst [vmem:[#allocation2 + $0x10] sm:$0xf0] %v612_v37  ;;  %v1851_v15 = vpop.permute.xlu0 %633  ;;  %v1853_v54 = vpop.permute.xlu1 %587 }
 0x192   :  { %v644_v14 = vsel %vm288_vm7, %v632_v12, %v1851_v15  ;;  %v603_v21 = vsel %vm253_vm6, %v1853_v54, %v590_v3 }
 0x193   :  { %648 = vst [vmem:[#allocation2 + $0xd0] sm:$0xf] %v644_v14  ;;  %v611_v40 = vrot.slane %v603_v21, 4 }
 0x195   :  { %623 = vst [vmem:[#allocation2 + $0xc0] sm:$0xf0] %v611_v40  ;;  %v1861_v17 = vpop.permute.xlu0 %629  ;;  %v524_v47 = vpop.permute.xlu1 %523 }
 0x196   :  { %v645_v48 = vsel %vm288_vm7, %v1861_v17, %v632_v12 }
 0x197   :  { %647 = vst [vmem:[#allocation2 + $0x58] sm:$0xf] %v645_v48 }
 0x199   :  { %v1866_v58 = vpop.permute.xlu0 %525  ;;  %v566_v39 = vpop.permute.xlu1 %565 }
 0x19a   :  { %v536_v28 = vsel %vm183_vm4, %v524_v47, %v1866_v58  ;;  %v684_v57 = vld [vmem:[#allocation2 + $0xd0] sm:$0xff] }
 0x19b   :  { %v546_v62 = vrot.slane %v536_v28, 4  ;;  %714 = vmatprep.subr.mxu0 %v684_v57 }
 0x19d   :  { %558 = vst [vmem:[#allocation2 + $0xa8] sm:$0xf0] %v546_v62  ;;  %v1871_v33 = vpop.permute.xlu0 %567  ;;  %v1873_v26 = vpop.permute.xlu1 %521 }
 0x19e   :  { %v578_v61 = vsel %vm218_vm5, %v566_v39, %v1871_v33  ;;  %v537_v52 = vsel %vm183_vm4, %v1873_v26, %v524_v47  ;;  %v683_v19 = vld [vmem:[#allocation2 + $0x58] sm:$0xff] }
 0x19f   :  { %582 = vst [vmem:[#allocation2 + $0x10] sm:$0xf] %v578_v61  ;;  %v545_v32 = vrot.slane %v537_v52, 4  ;;  %715 = vmatpush1.msra.mxu0 %v683_v19 }
 0x1a1   :  { %557 = vst [vmem:[#allocation2 + $0x60] sm:$0xf0] %v545_v32  ;;  %v1881_v24 = vpop.permute.xlu0 %563  ;;  %v474_v44 = vpop.permute.xlu1 %473 }
 0x1a2   :  { %v579_v43 = vsel %vm218_vm5, %v1881_v24, %v566_v39 }
 0x1a3   :  { %581 = vst [vmem:[#allocation2 + $0xc0] sm:$0xf] %v579_v43 }
 0x1a4   :  { %v672_v20 = vld [vmem:[#allocation2 + $0xa8] sm:$0xff] }
 0x1a5   :  { %v1886_v49 = vpop.permute.xlu0 %475  ;;  %v1888_v56 = vpop.permute.xlu1 %483 }
 0x1a6   :  { %v489_v22 = vsel %vm132_vm3, %v474_v44, %v1886_v49  ;;  %v490_v60 = vsel %vm132_vm3, %v1888_v56, %v474_v44  ;;  %v678_v29 = vld [vmem:[#allocation2 + $0x10] sm:$0xff] }
 0x1a7   :  { %v498_v18 = vrot.slane %v489_v22, 4  ;;  %v497_v35 = vrot.slane %v490_v60, 4  ;;  %716 = vmatprep.subr.mxu0 %v678_v29 }
 0x1a8   :  { %v671_v53 = vld [vmem:[#allocation2 + $0x60] sm:$0xff] }
 0x1a9   :  { %510 = vst [vmem:[#allocation2 + $0x48] sm:$0xf0] %v498_v18  ;;  %509 = vst [vmem:[#allocation2 + $0x30] sm:$0xf0] %v497_v35  ;;  %v408_v63 = vpop.permute.xlu0 %407  ;;  %v1896_v36 = vpop.permute.xlu1 %409 }
 0x1aa   :  { %v423_v55 = vsel %vm62_vm0, %v408_v63, %v1896_v36  ;;  %v677_v0 = vld [vmem:[#allocation2 + $0xc0] sm:$0xff] }
 0x1ab   :  { %v432_v10 = vrot.slane %v423_v55, 4  ;;  %717 = vmatpush1.msra.mxu0 %v677_v0 }
 0x1ac   :  { %718 = vmatprep.subr.mxu0 %v672_v20 }
 0x1ad   :  { %444 = vst [vmem:[#allocation2] sm:$0xf0] %v432_v10  ;;  %v450_v1 = vpop.permute.xlu0 %449  ;;  %719 = vmatpush1.msra.mxu0 %v671_v53  ;;  %v1901_v59 = vpop.permute.xlu1 %451 }
 0x1ae   :  { %v465_v16 = vsel %vm97_vm2, %v450_v1, %v1901_v59 }
 0x1af   :  { %468 = vst [vmem:[#allocation2 + $0x48] sm:$0xf] %v465_v16 }
 0x1b1   :  { %v594_v2 = vpop.permute.xlu0 %593  ;;  %v596_v27 = vpop.permute.xlu1 %595 }
 0x1b2   :  { %v601_v46 = vsel %vm253_vm6, %v1846_v9, %v594_v2  ;;  %v600_v50 = vsel %vm253_vm6, %v594_v2, %v596_v27 }
 0x1b3   :  { %v613_v11 = vrot.slane %v601_v46, 4  ;;  %v614_v51 = vrot.slane %v600_v50, 4 }
 0x1b5   :  { %625 = vst [vmem:[#allocation2 + $0x38] sm:$0xf0] %v613_v11  ;;  %626 = vst [vmem:[#allocation2 + $0x28] sm:$0xf0] %v614_v51  ;;  %v636_v45 = vpop.permute.xlu0 %635  ;;  %v1911_v5 = vpop.permute.xlu1 %637 }
 0x1b6   :  { %v643_v4 = vsel %vm288_vm7, %v1851_v15, %v636_v45  ;;  %v642_v6 = vsel %vm288_vm7, %v636_v45, %v1911_v5  ;;  %v666_v8 = vld [vmem:[#allocation2 + $0x48] sm:$0xff] }
 0x1b7   :  { %649 = vst [vmem:[#allocation2 + $0x98] sm:$0xf] %v643_v4  ;;  %650 = vst [vmem:[#allocation2 + $0xc8] sm:$0xf] %v642_v6  ;;  %720 = vmatprep.subr.mxu0 %v666_v8 }
 0x1b9   :  { %v1919_v30 = vpop.permute.xlu0 %417  ;;  %v1921_v41 = vpop.permute.xlu1 %459 }
 0x1ba   :  { %v424_v25 = vsel %vm62_vm0, %v1919_v30, %v408_v63  ;;  %v466_v7 = vsel %vm97_vm2, %v1921_v41, %v450_v1 }
 0x1bb   :  { %v431_v13 = vrot.slane %v424_v25, 4  ;;  %467 = vst [vmem:[#allocation2 + $0x30] sm:$0xf] %v466_v7 }
 0x1bd   :  { %443 = vst [vmem:[#allocation2 + $0xb0] sm:$0xf0] %v431_v13  ;;  %v384_v31 = vpop.permute.xlu0 %383  ;;  %v1929_v23 = vpop.permute.xlu1 %385 }
 0x1be   :  { %v399_v3 = vsel %vm32_vm1, %v384_v31, %v1929_v23  ;;  %v686_v9 = vld [vmem:[#allocation2 + $0xc8] sm:$0xff]  ;;  %v685_v12 = vld [vmem:[#allocation2 + $0x98] sm:$0xff] }
 0x1bf   :  { %402 = vst [vmem:[#allocation2] sm:$0xf] %v399_v3  ;;  %785 = vmatprep.subr.mxu1 %v686_v9 }
 0x1c0   :  { %786 = vmatpush1.msra.mxu1 %v685_v12 }
 0x1c1   :  { %v528_v34 = vpop.permute.xlu0 %527  ;;  %v1934_v37 = vpop.permute.xlu1 %529 }
 0x1c2   :  { %v535_v15 = vsel %vm183_vm4, %v1866_v58, %v528_v34  ;;  %v534_v14 = vsel %vm183_vm4, %v528_v34, %v1934_v37  ;;  %v665_v21 = vld [vmem:[#allocation2 + $0x30] sm:$0xff] }
 0x1c3   :  { %v547_v40 = vrot.slane %v535_v15, 4  ;;  %v548_v47 = vrot.slane %v534_v14, 4  ;;  %721 = vmatpush1.msra.mxu0 %v665_v21 }
 0x1c5   :  { %559 = vst [vmem:[#allocation2 + $0x70] sm:$0xf0] %v547_v40  ;;  %560 = vst [vmem:[#allocation2 + $0x40] sm:$0xf0] %v548_v47  ;;  %v570_v48 = vpop.permute.xlu0 %569  ;;  %v1942_v39 = vpop.permute.xlu1 %571 }
 0x1c6   :  { %v577_v28 = vsel %vm218_vm5, %v1871_v33, %v570_v48  ;;  %v576_v58 = vsel %vm218_vm5, %v570_v48, %v1942_v39  ;;  %v660_v57 = vld [vmem:[#allocation2] sm:$0xff] }
 0x1c7   :  { %583 = vst [vmem:[#allocation2 + $0x38] sm:$0xf] %v577_v28  ;;  %584 = vst [vmem:[#allocation2 + $0x28] sm:$0xf] %v576_v58  ;;  %722 = vmatprep.subr.mxu0 %v660_v57 }
 0x1c9   :  { %v1950_v62 = vpop.permute.xlu0 %393  ;;  %v478_v61 = vpop.permute.xlu1 %477 }
 0x1ca   :  { %v400_v52 = vsel %vm32_vm1, %v1950_v62, %v384_v31  ;;  %v488_v19 = vsel %vm132_vm3, %v1886_v49, %v478_v61 }
 0x1cb   :  { %401 = vst [vmem:[#allocation2 + $0xb0] sm:$0xf] %v400_v52  ;;  %v499_v33 = vrot.slane %v488_v19, 4 }
 0x1cc   :  { %v674_v55 = vld [vmem:[#allocation2 + $0x40] sm:$0xff]  ;;  %v673_v20 = vld [vmem:[#allocation2 + $0x70] sm:$0xff] }
 0x1cd   :  { %511 = vst [vmem:[#allocation2 + $0x80] sm:$0xf0] %v499_v33  ;;  %v1958_v32 = vpop.permute.xlu0 %479  ;;  %v598_v44 = vpop.permute.xlu1 %597 }
 0x1ce   :  { %v487_v43 = vsel %vm132_vm3, %v478_v61, %v1958_v32  ;;  %v599_v22 = vsel %vm253_vm6, %v596_v27, %v598_v44  ;;  %v604_v60 = vsel %vm253_vm6, %v598_v44, %v1853_v54  ;;  %v680_v29 = vld [vmem:[#allocation2 + $0x28] sm:$0xff]  ;;  %v679_v18 = vld [vmem:[#allocation2 + $0x38] sm:$0xff]  ;;  %v1980_v27 = vld [vmem:[%s2154_s1] sm:$0xff] }
 0x1cf   :  { %v500_v49 = vrot.slane %v487_v43, 4  ;;  %v615_v35 = vrot.slane %v599_v22, 4  ;;  %v616_v63 = vrot.slane %v604_v60, 4  ;;  %787 = vmatprep.subr.mxu1 %v680_v29 }
 0x1d0   :  { %788 = vmatpush1.msra.mxu1 %v679_v18 }
 0x1d1   :  { %512 = vst [vmem:[#allocation2 + $0x88] sm:$0xf0] %v500_v49  ;;  %627 = vst [vmem:[#allocation2 + $0x90] sm:$0xf0] %v615_v35  ;;  %v640_v0 = vpop.permute.xlu0 %639  ;;  %789 = vmatprep.subr.mxu1 %v674_v55  ;;  %v412_v10 = vpop.permute.xlu1 %411  ;;  %v910_v35 = vcvt.s32.f32 %v1500_v42  ;;  %v906_v55 = vadd.s32 256, %v1500_v42 }
 0x1d2   :  { %628 = vst [vmem:[#allocation2 + $0xa0] sm:$0xf0] %v616_v63  ;;  %v641_v54 = vsel %vm288_vm7, %v1911_v5, %v640_v0  ;;  %v646_v53 = vsel %vm288_vm7, %v640_v0, %v1861_v17  ;;  %v422_v1 = vsel %vm62_vm0, %v1896_v36, %v412_v10  ;;  %790 = vmatpush1.msra.mxu1 %v673_v20  ;;  %v659_v16 = vld [vmem:[#allocation2 + $0xb0] sm:$0xff]  ;;  %v907_v20 = vadd.s32 384, %v1500_v42 }
 0x1d3   :  { %651 = vst [vmem:[#allocation2 + $0xe0] sm:$0xf] %v641_v54  ;;  %652 = vst [vmem:[#allocation2 + $0x20] sm:$0xf] %v646_v53  ;;  %v433_v2 = vrot.slane %v422_v1, 4  ;;  %723 = vmatpush1.msra.mxu0 %v659_v16  ;;  %v916_v0 = vadd.f32 0.5, %v910_v35  ;;  %v912_v54 = vcvt.s32.f32 %v906_v55 }
 0x1d4   :  { %1200 = vmatmul.mubr.msk.f32.vlgmr.msra.gmra.mxu0 %vm689_vm8, %v1980_v27  ;;  %v913_v16 = vcvt.s32.f32 %v907_v20 }
 0x1d5   :  { %445 = vst [vmem:[#allocation2 + $0xd8] sm:$0xf0] %v433_v2  ;;  %v414_v17 = vpop.permute.xlu0 %413  ;;  %v454_v46 = vpop.permute.xlu1 %453  ;;  %898 = vmatprep.mubr.f32.mxu0 %v1297_v38  ;;  %v922_v53 = vmul.f32 0.0026041667, %v916_v0  ;;  %v918_v2 = vadd.f32 0.5, %v912_v54 }
 0x1d6   :  { %v421_v36 = vsel %vm62_vm0, %v412_v10, %v414_v17  ;;  %v464_v50 = vsel %vm97_vm2, %v1901_v59, %v454_v46 }
 0x1d7   :  { %v434_v11 = vrot.slane %v421_v36, 4  ;;  %469 = vst [vmem:[#allocation2 + $0x80] sm:$0xf] %v464_v50  ;;  %v919_v50 = vadd.f32 0.5, %v913_v16 }
 0x1d9   :  { %446 = vst [vmem:[#allocation2 + $0x18] sm:$0xf0] %v434_v11  ;;  %v456_v51 = vpop.permute.xlu0 %455  ;;  %v532_v45 = vpop.permute.xlu1 %531  ;;  %v909_v11 = vadd.s32 640, %v1500_v42 }
 0x1da   :  { %v463_v5 = vsel %vm97_vm2, %v454_v46, %v456_v51  ;;  %v533_v4 = vsel %vm183_vm4, %v1934_v37, %v532_v45  ;;  %v538_v6 = vsel %vm183_vm4, %v532_v45, %v1873_v26  ;;  %v688_v8 = vld [vmem:[#allocation2 + $0x20] sm:$0xff]  ;;  %v928_v46 = vfloor.f32 %v922_v53 }
 0x1db   :  { %v687_v25 = vld [vmem:[#allocation2 + $0xe0] sm:$0xff]  ;;  %470 = vst [vmem:[#allocation2 + $0x88] sm:$0xf] %v463_v5  ;;  %v549_v59 = vrot.slane %v533_v4, 4  ;;  %v550_v7 = vrot.slane %v538_v6, 4  ;;  %856 = vmatprep.subr.mxu0 %v688_v8  ;;  %v915_v8 = vcvt.s32.f32 %v909_v11  ;;  %v1298_v11 = vmov 49  }
 0x1dc   :  { %857 = vmatpush1.msra.mxu0 %v687_v25  ;;  %v934_v5 = vmul.f32 384.0, %v928_v46  ;;  %v925_v6 = vmul.f32 0.0026041667, %v919_v50  ;;  %1241 = vset.pattern.permute.xlu0 %v1298_v11 }
 0x1dd   :  { %561 = vst [vmem:[#allocation2 + $0x8] sm:$0xf0] %v549_v59  ;;  %562 = vst [vmem:[#allocation2 + $0x78] sm:$0xf0] %v550_v7  ;;  %v574_v13 = vpop.permute.xlu0 %573  ;;  %v388_v31 = vpop.permute.xlu1 %387 }
 0x1de   :  { %v575_v3 = vsel %vm218_vm5, %v1942_v39, %v574_v13  ;;  %v580_v9 = vsel %vm218_vm5, %v574_v13, %v1881_v24  ;;  %v398_v26 = vsel %vm32_vm1, %v1929_v23, %v388_v31  ;;  %v667_v40 = vld [vmem:[#allocation2 + $0x80] sm:$0xff]  ;;  %v940_v7 = vsub.f32 %v910_v35, %v934_v5 }
 0x1df   :  { %585 = vst [vmem:[#allocation2 + $0x90] sm:$0xf] %v575_v3  ;;  %586 = vst [vmem:[#allocation2 + $0xa0] sm:$0xf] %v580_v9  ;;  %v921_v3 = vadd.f32 0.5, %v915_v8 }
 0x1e0   :  { %403 = vst [vmem:[#allocation2 + $0xd8] sm:$0xf] %v398_v26 }
 0x1e1   :  { %v390_v12 = vpop.permute.xlu0 %389  ;;  %v482_v34 = vpop.permute.xlu1 %481 }
 0x1e2   :  { %v397_v37 = vsel %vm32_vm1, %v388_v31, %v390_v12  ;;  %v485_v15 = vsel %vm132_vm3, %v482_v34, %v1888_v56  ;;  %v486_v24 = vsel %vm132_vm3, %v1958_v32, %v482_v34  ;;  %v668_v14 = vld [vmem:[#allocation2 + $0x88] sm:$0xff]  ;;  %v931_v31 = vfloor.f32 %v925_v6 }
 0x1e3   :  { %404 = vst [vmem:[#allocation2 + $0x18] sm:$0xf] %v397_v37  ;;  %v501_v21 = vrot.slane %v486_v24, 4  ;;  %v502_v23 = vrot.slane %v485_v15, 4  ;;  %791 = vmatprep.subr.mxu1 %v668_v14  ;;  %v927_v15 = vmul.f32 0.0026041667, %v921_v3 }
 0x1e4   :  { %792 = vmatpush1.msra.mxu1 %v667_v40  ;;  %v676_v33 = vld [vmem:[#allocation2 + $0x78] sm:$0xff]  ;;  %v675_v32 = vld [vmem:[#allocation2 + $0x8] sm:$0xff]  ;;  %v937_v37 = vmul.f32 384.0, %v931_v31 }
 0x1e5   :  { %513 = vst [vmem:[#allocation2 + $0xe8] sm:$0xf0] %v501_v21  ;;  %514 = vst [vmem:[#allocation2 + $0xb8] sm:$0xf0] %v502_v23  ;;  %v416_v47 = vpop.permute.xlu0 %415  ;;  %v458_v48 = vpop.permute.xlu1 %457  ;;  %v933_v40 = vfloor.f32 %v927_v15 }
 0x1e6   :  { %v419_v39 = vsel %vm62_vm0, %v416_v47, %v1919_v30  ;;  %v420_v56 = vsel %vm62_vm0, %v414_v17, %v416_v47  ;;  %v461_v28 = vsel %vm97_vm2, %v458_v48, %v1921_v41  ;;  %v462_v58 = vsel %vm97_vm2, %v456_v51, %v458_v48  ;;  %v682_v57 = vld [vmem:[#allocation2 + $0xa0] sm:$0xff]  ;;  %v681_v61 = vld [vmem:[#allocation2 + $0x90] sm:$0xff] }
 0x1e7   :  { %v435_v52 = vrot.slane %v420_v56, 4  ;;  %v436_v19 = vrot.slane %v419_v39, 4  ;;  %471 = vst [vmem:[#allocation2 + $0xe8] sm:$0xf] %v462_v58  ;;  %472 = vst [vmem:[#allocation2 + $0xb8] sm:$0xf] %v461_v28  ;;  %858 = vmatprep.subr.mxu0 %v682_v57  ;;  %v943_v23 = vsub.f32 %v913_v16, %v937_v37 }
 0x1e8   :  { %859 = vmatpush1.msra.mxu0 %v681_v61  ;;  %v661_v22 = vld [vmem:[#allocation2 + $0xd8] sm:$0xff]  ;;  %v908_v17 = vadd.s32 512, %v1500_v42  ;;  %v924_v51 = vmul.f32 0.0026041667, %v918_v2  ;;  %v939_v58 = vmul.f32 384.0, %v933_v40 }
 0x1e9   :  { %447 = vst [vmem:[#allocation2 + $0x50] sm:$0xf0] %v435_v52  ;;  %448 = vst [vmem:[#allocation2 + $0x68] sm:$0xf0] %v436_v19  ;;  %v392_v30 = vpop.permute.xlu0 %391  ;;  %860 = vmatprep.subr.mxu0 %v676_v33  ;;  %v949_v28 = vadd.f32 0.5, %v943_v23 }
 0x1ea   :  { %v395_v41 = vsel %vm32_vm1, %v392_v30, %v1950_v62  ;;  %v396_v44 = vsel %vm32_vm1, %v390_v12, %v392_v30  ;;  %861 = vmatpush1.msra.mxu0 %v675_v32  ;;  %v662_v43 = vld [vmem:[#allocation2 + $0x18] sm:$0xff]  ;;  %v905_v62 = vadd.s32 128, %v1500_v42  ;;  %v914_v45 = vcvt.s32.f32 %v908_v17 }
 0x1eb   :  { %405 = vst [vmem:[#allocation2 + $0x50] sm:$0xf] %v396_v44  ;;  %406 = vst [vmem:[#allocation2 + $0x68] sm:$0xf] %v395_v41  ;;  %793 = vmatprep.subr.mxu1 %v662_v43  ;;  %v930_v25 = vfloor.f32 %v924_v51  ;;  %v946_v12 = vadd.f32 0.5, %v940_v7  ;;  %v945_v30 = vsub.f32 %v915_v8, %v939_v58 }
 0x1ec   :  { %794 = vmatpush1.msra.mxu1 %v661_v22  ;;  %v911_v63 = vcvt.s32.f32 %v905_v62  ;;  %v920_v59 = vadd.f32 0.5, %v914_v45  ;;  %v955_v33 = vmul.f32 0.055555556, %v949_v28 }
 0x1ed   :  { %1201 = vmatmul.mubr.msk.f32.vlgmr.msra.gmra.mxu1 %vm689_vm8, %v1980_v27  ;;  %v936_v9 = vmul.f32 384.0, %v930_v25  ;;  %v952_v14 = vmul.f32 0.055555556, %v946_v12 }
 0x1ee   :  { %v670_v60 = vld [vmem:[#allocation2 + $0xb8] sm:$0xff]  ;;  %v669_v29 = vld [vmem:[#allocation2 + $0xe8] sm:$0xff]  ;;  %v917_v10 = vadd.f32 0.5, %v911_v63  ;;  %v926_v26 = vmul.f32 0.0026041667, %v920_v59  ;;  %v961_v22 = vfloor.f32 %v955_v33 }
 0x1ef   :  { %862 = vmatprep.subr.mxu0 %v670_v60  ;;  %v942_v24 = vsub.f32 %v912_v54, %v936_v9  ;;  %v958_v39 = vfloor.f32 %v952_v14  ;;  %v951_v60 = vadd.f32 0.5, %v945_v30 }
 0x1f0   :  { %863 = vmatpush1.msra.mxu0 %v669_v29  ;;  %v923_v1 = vmul.f32 0.0026041667, %v917_v10  ;;  %v932_v42 = vfloor.f32 %v926_v26  ;;  %v967_v62 = vmul.f32 18.0, %v961_v22 }
 0x1f1   :  { %v948_v47 = vadd.f32 0.5, %v942_v24  ;;  %v964_v52 = vmul.f32 18.0, %v958_v39  ;;  %vm976_vm9 = vcmp.ge.f32.partialorder %v958_v39, 1.0  ;;  %vm982_vm10 = vcmp.le.f32.partialorder %v958_v39, 16.0 }
 0x1f2   :  { %v664_v18 = vld [vmem:[#allocation2 + $0x68] sm:$0xff]  ;;  %v663_v49 = vld [vmem:[#allocation2 + $0x50] sm:$0xff]  ;;  %v929_v36 = vfloor.f32 %v923_v1  ;;  %v938_v48 = vmul.f32 384.0, %v932_v42  ;;  %vm2040_vm15 = vmand %vm976_vm9, %vm982_vm10  ;;  %v957_v35 = vmul.f32 0.055555556, %v951_v60  ;;  %v973_v54 = vsub.f32 %v943_v23, %v967_v62 }
 0x1f3   :  { %864 = vmatprep.subr.mxu0 %v664_v18  ;;  %v954_v57 = vmul.f32 0.055555556, %v948_v47  ;;  %v970_v44 = vsub.f32 %v940_v7, %v964_v52  ;;  %v1301_v7 = vmov 51  }
 0x1f4   :  { %865 = vmatpush1.msra.mxu0 %v663_v49  ;;  %v935_v4 = vmul.f32 384.0, %v929_v36  ;;  %v944_v61 = vsub.f32 %v914_v45, %v938_v48  ;;  %v963_v53 = vfloor.f32 %v957_v35  ;;  %v1300_v45 = vmov 52  }
 0x1f5   :  { %1202 = vmatmul.mubr.msk.f32.vlgmr.msra.gmra.mxu0 %vm689_vm8, %v1980_v27  ;;  %v960_v32 = vfloor.f32 %v954_v57  ;;  %vm994_vm13 = vcmp.ge.f32.partialorder %v970_v44, 1.0  ;;  %vm1000_vm14 = vcmp.le.f32.partialorder %v970_v44, 16.0 }
 0x1f6   :  { %v941_v13 = vsub.f32 %v911_v63, %v935_v4  ;;  %v950_v41 = vadd.f32 0.5, %v944_v61  ;;  %vm2048_vm3 = vmand %vm994_vm13, %vm1000_vm14  ;;  %vm997_vm14 = vcmp.ge.f32.partialorder %v973_v54, 1.0  ;;  %v969_v17 = vmul.f32 18.0, %v963_v53 }
 0x1f7   :  { %v966_v29 = vmul.f32 18.0, %v960_v32  ;;  %vm1012_vm5 = vmand %vm2040_vm15, %vm2048_vm3  ;;  %vm978_vm6 = vcmp.ge.f32.partialorder %v960_v32, 1.0  ;;  %vm984_vm7 = vcmp.le.f32.partialorder %v960_v32, 16.0 }
 0x1f8   :  { %v947_v34 = vadd.f32 0.5, %v941_v13  ;;  %v956_v18 = vmul.f32 0.055555556, %v950_v41  ;;  %vm2066_vm13 = vmand %vm978_vm6, %vm984_vm7  ;;  %v2071_v46 = vsel %vm1012_vm5, 1.0, %v1297_v38  ;;  %v975_v6 = vsub.f32 %v945_v30, %v969_v17 }
 0x1f9   :  { %v972_v0 = vsub.f32 %v942_v24, %v966_v29 }
 0x1fa   :  { %v953_v21 = vmul.f32 0.055555556, %v947_v34  ;;  %v962_v10 = vfloor.f32 %v956_v18 }
 0x1fb   :  { %vm996_vm9 = vcmp.ge.f32.partialorder %v972_v0, 1.0  ;;  %vm1002_vm10 = vcmp.le.f32.partialorder %v972_v0, 16.0 }
 0x1fc   :  { %v959_v56 = vfloor.f32 %v953_v21  ;;  %v968_v16 = vmul.f32 18.0, %v962_v10  ;;  %vm1008_vm15 = vmand %vm996_vm9, %vm1002_vm10  ;;  %vm980_vm5 = vcmp.ge.f32.partialorder %v962_v10, 1.0  ;;  %vm986_vm6 = vcmp.le.f32.partialorder %v962_v10, 16.0 }
 0x1fd   :  { %vm1014_vm3 = vmand %vm2066_vm13, %vm1008_vm15  ;;  %vm981_vm10 = vcmp.ge.f32.partialorder %v963_v53, 1.0  ;;  %vm999_vm13 = vcmp.ge.f32.partialorder %v975_v6, 1.0 }
 0x1fe   :  { %v965_v19 = vmul.f32 18.0, %v959_v56  ;;  %vm977_vm11 = vcmp.ge.f32.partialorder %v959_v56, 1.0  ;;  %vm983_vm12 = vcmp.le.f32.partialorder %v959_v56, 16.0  ;;  %v974_v51 = vsub.f32 %v944_v61, %v968_v16 }
 0x1ff   :  { %vm2044_vm2 = vmand %vm977_vm11, %vm983_vm12  ;;  %vm979_vm11 = vcmp.ge.f32.partialorder %v961_v22, 1.0  ;;  %vm985_vm12 = vcmp.le.f32.partialorder %v961_v22, 16.0  ;;  %v2094_v8 = vsel %vm1014_vm3, 1.0, %v1297_v38 }
 0x200   :  { %v971_v43 = vsub.f32 %v941_v13, %v965_v19  ;;  %vm1004_vm9 = vcmp.le.f32.partialorder %v974_v51, 16.0 }
 0x202   :  { %vm995_vm0 = vcmp.ge.f32.partialorder %v971_v43, 1.0  ;;  %vm1001_vm1 = vcmp.le.f32.partialorder %v971_v43, 16.0 }
 0x203   :  { %vm2052_vm4 = vmand %vm995_vm0, %vm1001_vm1  ;;  %vm1003_vm0 = vcmp.le.f32.partialorder %v973_v54, 16.0 }
 0x204   :  { %vm1013_vm8 = vmand %vm2044_vm2, %vm2052_vm4  ;;  %vm1036_vm4 = vcmask 1043456  }
 0x205   :  { %v2074_v50 = vsel %vm1013_vm8, 1.0, %v1297_v38  ;;  %vm2076_vm1 = vmand %vm979_vm11, %vm985_vm12  ;;  %vm998_vm8 = vcmp.ge.f32.partialorder %v974_v51, 1.0  ;;  %vm987_vm11 = vcmp.le.f32.partialorder %v963_v53, 16.0  ;;  %v1299_v51 = vmov 50  }
 0x206   :  { %vm2080_vm2 = vmand %vm997_vm14, %vm1003_vm0  ;;  %vm1005_vm14 = vcmp.le.f32.partialorder %v975_v6, 16.0  ;;  %1242 = vset.pattern.permute.xlu1 %v1299_v51 }
 0x207   :  { %vm1015_vm7 = vmand %vm2076_vm1, %vm2080_vm2 }
 0x208   :  { %vm2098_vm12 = vmand %vm980_vm5, %vm986_vm6  ;;  %v2103_v31 = vsel %vm1015_vm7, 1.0, %v1297_v38  ;;  %vm1135_vm5 = vcmask 7168   ;;  %vm1142_vm6 = vcmask 11264   ;;  %vm1194_vm7 = vcmask 9216  }
 0x209   :  { %vm1010_vm0 = vmand %vm998_vm8, %vm1004_vm9 }
 0x20a   :  { %vm993_vm15 = vmand %vm981_vm10, %vm987_vm11 }
 0x20b   :  { %vm1011_vm1 = vmand %vm999_vm13, %vm1005_vm14 }
 0x20c   :  { %vm1016_vm2 = vmand %vm2098_vm12, %vm1010_vm0 }
 0x20d   :  { %vm1017_vm3 = vmand %vm993_vm15, %vm1011_vm1  ;;  %v2111_v15 = vsel %vm1016_vm2, 1.0, %v1297_v38 }
 0x20e   :  { %v2115_v14 = vsel %vm1017_vm3, 1.0, %v1297_v38 }
 0x294   :  { %v2056_v1 = vpop.f32.mrf.mxu0 }
 0x295   :  { %v1030_v5 = vmul.f32 %v2071_v46, %v2056_v1 }
 0x296   :  { %v760_v36 = vpop.f32.mrf.mxu0 }
 0x297   :  { %v1031_v4 = vmul.f32 %v2074_v50, %v760_v36  ;;  %v1037_v25 = vsel %vm1036_vm4, %v1030_v5, 0.0 }
 0x299   :  { %v1038_v59 = vsel %vm1036_vm4, %v1031_v4, 0.0 }
 0x29a   :  { %v1039_v9 = vadd.f32 %v1038_v59, %v1037_v25 }
 0x2ad   :  { %v829_v13 = vpop.f32.mrf.mxu1 }
 0x2ae   :  { %v1032_v3 = vmul.f32 %v2094_v8, %v829_v13 }
 0x2af   :  { %v831_v26 = vpop.f32.mrf.mxu1 }
 0x2b0   :  { %v1040_v12 = vsel %vm1036_vm4, %v1032_v3, 0.0  ;;  %v1033_v34 = vmul.f32 %v2103_v31, %v831_v26 }
 0x2b1   :  { %v1041_v37 = vadd.f32 %v1040_v12, %v1039_v9 }
 0x2b2   :  { %v1042_v24 = vsel %vm1036_vm4, %v1033_v34, 0.0 }
 0x2b3   :  { %v1043_v23 = vadd.f32 %v1042_v24, %v1041_v37 }
 0x2b5   :  { %v900_v42 = vpop.f32.mrf.mxu0 }
 0x2b6   :  { %v1034_v21 = vmul.f32 %v2111_v15, %v900_v42 }
 0x2b7   :  { %v902_v40 = vpop.f32.mrf.mxu0 }
 0x2b8   :  { %v1044_v47 = vsel %vm1036_vm4, %v1034_v21, 0.0  ;;  %v1035_v48 = vmul.f32 %v2115_v14, %v902_v40 }
 0x2b9   :  { %v1045_v39 = vadd.f32 %v1044_v47, %v1043_v23 }
 0x2ba   :  { %v1046_v56 = vsel %vm1036_vm4, %v1035_v48, 0.0 }
 0x2bb   :  { %v1047_v28 = vadd.f32 %v1046_v56, %v1045_v39 }
 0x2bd   :  { %1048 = vadd.xlane.f32.xlu1 %v1047_v28 }
 0x2ce   :  { %1098 = vperm.xlu1 %1242, %v1980_v27  }
 0x2d2   :  { %1243 = vset.pattern.permute.xlu1 %v1300_v45 }
 0x2d3   :  { %1156 = vperm.xlu1 %1243, %v1980_v27  }
 0x2d7   :  { %1244 = vset.pattern.permute.xlu1 %v1301_v7 }
 0x346   :  { %v1049_v58 = vpop.xlane.xlu1 %1048 }
 0x347   :  { %v1050_v57 = vmul.f32 0.001953125, %v1049_v58 }
 0x349   :  { %v1051_v61 = vsub.f32 %v2056_v1, %v1050_v57  ;;  %v1052_v52 = vsub.f32 %v760_v36, %v1050_v57  ;;  %v1053_v38 = vsub.f32 %v829_v13, %v1050_v57  ;;  %v1054_v19 = vsub.f32 %v831_v26, %v1050_v57 }
 0x34a   :  { %v1055_v33 = vsub.f32 %v900_v42, %v1050_v57  ;;  %v1056_v30 = vsub.f32 %v902_v40, %v1050_v57  ;;  %v1302_v13 = vmov 53   ;;  %v1099_v9 = vpop.permute.xlu1 %1098 }
 0x34b   :  { %v1057_v32 = vmul.f32 %v2071_v46, %v1051_v61  ;;  %v1058_v41 = vmul.f32 %v2074_v50, %v1052_v52  ;;  %v1059_v44 = vmul.f32 %v2094_v8, %v1053_v38  ;;  %v1060_v43 = vmul.f32 %v2103_v31, %v1054_v19 }
 0x34c   :  { %v1061_v22 = vmul.f32 %v2111_v15, %v1055_v33  ;;  %v1062_v49 = vmul.f32 %v2115_v14, %v1056_v30 }
 0x34d   :  { %v1063_v60 = vmul.f32 %v1057_v32, %v1057_v32  ;;  %v1064_v29 = vmul.f32 %v1058_v41, %v1058_v41  ;;  %v1065_v18 = vmul.f32 %v1059_v44, %v1059_v44  ;;  %v1066_v62 = vmul.f32 %v1060_v43, %v1060_v43 }
 0x34e   :  { %v1067_v0 = vmul.f32 %v1061_v22, %v1061_v22  ;;  %v1068_v54 = vmul.f32 %v1062_v49, %v1062_v49 }
 0x34f   :  { %v1069_v35 = vsel %vm1036_vm4, %v1063_v60, 0.0  ;;  %v1070_v63 = vsel %vm1036_vm4, %v1064_v29, 0.0  ;;  %v1072_v10 = vsel %vm1036_vm4, %v1065_v18, 0.0  ;;  %v1074_v53 = vsel %vm1036_vm4, %v1066_v62, 0.0 }
 0x350   :  { %v1071_v55 = vadd.f32 %v1070_v63, %v1069_v35  ;;  %v1076_v16 = vsel %vm1036_vm4, %v1067_v0, 0.0  ;;  %v1078_v17 = vsel %vm1036_vm4, %v1068_v54, 0.0 }
 0x352   :  { %v1073_v20 = vadd.f32 %v1072_v10, %v1071_v55 }
 0x354   :  { %v1075_v1 = vadd.f32 %v1074_v53, %v1073_v20 }
 0x356   :  { %v1077_v2 = vadd.f32 %v1076_v16, %v1075_v1 }
 0x358   :  { %v1079_v36 = vadd.f32 %v1078_v17, %v1077_v2 }
 0x35a   :  { %1080 = vadd.xlane.f32.xlu0 %v1079_v36 }
 0x3e3   :  { %v1081_v5 = vpop.xlane.xlu0 %1080 }
 0x3e4   :  { %v1082_v4 = vmul.f32 0.001953125, %v1081_v5 }
 0x3e6   :  { %v1083_v6 = vadd.f32 1e-05, %v1082_v4 }
 0x3e8   :  { %1271 = vrsqrt.f32 %v1083_v6 }
 0x3f5   :  { %v1272_v25 = vpop.eup %1271 }
 0x3f6   :  { %v1085_v59 = vmul.f32 %v1980_v27, %v1272_v25 }
 0x3f8   :  { %1088 = vperm.xlu0 %1241, %v1085_v59  }
 0x3fc   :  { %1245 = vset.pattern.permute.xlu0 %v1302_v13 }
 0x473   :  { %v1089_v3 = vpop.permute.xlu0 %1088 }
 0x474   :  { %v1091_v26 = vmul.f32 %v1089_v3, %v1057_v32  ;;  %v1092_v12 = vmul.f32 %v1089_v3, %v1058_v41  ;;  %v1094_v34 = vmul.f32 %v1089_v3, %v1060_v43  ;;  %v1095_v37 = vmul.f32 %v1089_v3, %v1061_v22 }
 0x475   :  { %v1096_v24 = vmul.f32 %v1089_v3, %v1062_v49  ;;  %v1093_v42 = vmul.f32 %v1089_v3, %v1059_v44 }
 0x476   :  { %v1104_v21 = vadd.f32 %v1099_v9, %v1094_v34  ;;  %v1105_v23 = vadd.f32 %v1099_v9, %v1095_v37  ;;  %v1101_v40 = vadd.f32 %v1099_v9, %v1091_v26  ;;  %v1102_v47 = vadd.f32 %v1099_v9, %v1092_v12 }
 0x477   :  { %v1106_v48 = vadd.f32 %v1099_v9, %v1096_v24  ;;  %v1103_v39 = vadd.f32 %v1099_v9, %v1093_v42 }
 0x478   :  { %v1110_v56 = vmax.f32 %v1104_v21, 0.0  ;;  %v1111_v28 = vmax.f32 %v1105_v23, 0.0  ;;  %v1107_v58 = vmax.f32 %v1101_v40, 0.0  ;;  %v1108_v57 = vmax.f32 %v1102_v47, 0.0 }
 0x479   :  { %v1112_v61 = vmax.f32 %v1106_v48, 0.0  ;;  %v1109_v52 = vmax.f32 %v1103_v39, 0.0 }
 0x47a   :  { %v1116_v38 = vmul.f32 %v2103_v31, %v1110_v56  ;;  %v1117_v19 = vmul.f32 %v2111_v15, %v1111_v28  ;;  %v1113_v33 = vmul.f32 %v2071_v46, %v1107_v58  ;;  %v1114_v30 = vmul.f32 %v2074_v50, %v1108_v57 }
 0x47b   :  { %v1118_v32 = vmul.f32 %v2115_v14, %v1112_v61  ;;  %v1115_v41 = vmul.f32 %v2094_v8, %v1109_v52  ;;  %v1157_v8 = vpop.permute.xlu1 %1156 }
 0x47c   :  { %v1127_v44 = vsel %vm1036_vm4, %v1116_v38, 0.0  ;;  %v1128_v43 = vsel %vm1036_vm4, %v1117_v19, 0.0  ;;  %v1119_v22 = vsel %vm1036_vm4, %v1113_v33, 0.0  ;;  %v1120_v60 = vsel %vm1036_vm4, %v1114_v30, 0.0 }
 0x47d   :  { %v1129_v29 = vadd.f32 %v1128_v43, %v1127_v44  ;;  %v1121_v31 = vadd.f32 %v1120_v60, %v1119_v22  ;;  %v1130_v15 = vsel %vm1036_vm4, %v1118_v32, 0.0  ;;  %v1122_v46 = vsel %vm1036_vm4, %v1115_v41, 0.0 }
 0x47e   :  { %vm1192_vm4 = vcmask 1040384  }
 0x47f   :  { %v1131_v18 = vadd.f32 %v1130_v15, %v1129_v29  ;;  %v1123_v50 = vadd.f32 %v1122_v46, %v1121_v31 }
 0x481   :  { %1132 = vadd.xlane.f32.xlu0 %v1131_v18  ;;  %1124 = vadd.xlane.f32.xlu1 %v1123_v50 }
 0x492   :  { %1138 = vperm.xlu1 %1244, %v1980_v27  }
 0x497   :  { %1151 = vperm.xlu0 %1245, %v1980_v27  }
 0x49b   :  { %1246 = vset.pattern.permute.xlu0 %v1300_v45 }
 0x50a   :  { %v1133_v14 = vpop.xlane.xlu0 %1132  ;;  %v1125_v49 = vpop.xlane.xlu1 %1124 }
 0x50b   :  { %v1134_v62 = vmul.f32 0.00390625, %v1133_v14  ;;  %v1126_v35 = vmul.f32 0.00390625, %v1125_v49 }
 0x50d   :  { %v1136_v63 = vsel %vm1135_vm5, %v1126_v35, %v1134_v62 }
 0x50e   :  { %v1159_v55 = vmul.f32 %v1157_v8, %v1136_v63  ;;  %v1139_v0 = vpop.permute.xlu1 %1138 }
 0x50f   :  { %v1141_v10 = vmul.f32 %v1139_v0, %v1136_v63 }
 0x510   :  { %v1160_v20 = vsel %vm1142_vm6, %v1159_v55, 0.0 }
 0x511   :  { %v1161_v54 = vrot.slane %v1160_v20, 4  ;;  %v1143_v53 = vsel %vm1142_vm6, %v1141_v10, 0.0 }
 0x512   :  { %v1144_v1 = vrot.slane %v1143_v53, 4  ;;  %v1152_v45 = vpop.permute.xlu0 %1151 }
 0x513   :  { %v1162_v16 = vadd.f32 %v1161_v54, %v1160_v20 }
 0x514   :  { %v1145_v2 = vadd.f32 %v1144_v1, %v1143_v53 }
 0x515   :  { %v1163_v17 = vrot.slane %v1162_v16, 2 }
 0x516   :  { %v1146_v27 = vrot.slane %v1145_v2, 2 }
 0x517   :  { %v1164_v36 = vadd.f32 %v1163_v17, %v1162_v16 }
 0x518   :  { %v1147_v11 = vadd.f32 %v1146_v27, %v1145_v2 }
 0x519   :  { %v1165_v51 = vrot.slane %v1164_v36, 1 }
 0x51a   :  { %v1148_v5 = vrot.slane %v1147_v11, 1 }
 0x51b   :  { %v1166_v4 = vadd.f32 %v1165_v51, %v1164_v36 }
 0x51c   :  { %v1149_v6 = vadd.f32 %v1148_v5, %v1147_v11 }
 0x51d   :  { %v1167_v25 = vadd.f32 %v1166_v4, %v1152_v45 }
 0x51e   :  { %v1154_v59 = vadd.f32 %v1152_v45, %v1149_v6 }
 0x51f   :  { %v1169_v7 = vrot.slane %v1167_v25, 1 }
 0x521   :  { %v1171_v13 = vmax.f32 %v1154_v59, %v1169_v7 }
 0x523   :  { %v1172_v3 = vsub.f32 %v1154_v59, %v1171_v13  ;;  %v1176_v9 = vrot.slane %v1171_v13, 7 }
 0x525   :  { %v1178_v26 = vsub.f32 %v1167_v25, %v1176_v9  ;;  %v1173_v12 = vmul.f32 1.442695, %v1172_v3 }
 0x527   :  { %v1179_v34 = vmul.f32 1.442695, %v1178_v26 }
 0x529   :  { %1273 = vpow2.f32 %v1179_v34 }
 0x52a   :  { %1275 = vpow2.f32 %v1173_v12 }
 0x536   :  { %v1274_v37 = vpop.eup %1273 }
 0x537   :  { %v1182_v24 = vrot.slane %v1274_v37, 1  ;;  %v1276_v42 = vpop.eup %1275 }
 0x539   :  { %v1184_v21 = vadd.f32 %v1276_v42, %v1182_v24 }
 0x53b   :  { %1277 = vrcp.f32 %v1184_v21 }
 0x548   :  { %v1278_v23 = vpop.eup %1277 }
 0x549   :  { %v1189_v40 = vrot.slane %v1278_v23, 7  ;;  %v1187_v47 = vmul.f32 %v1278_v23, %v1276_v42 }
 0x54b   :  { %v1191_v48 = vmul.f32 %v1274_v37, %v1189_v40 }
 0x54d   :  { %v1193_v39 = vsel %vm1192_vm4, %v1187_v47, %v1191_v48 }
 0x54e   :  { %1195 = vst.msk [vmem:[%s2156_s2] sm:$0x3] %vm1194_vm7, %v1193_v39 }

</bundles_post_ra>
